<compile_context>
chip_gen: v7x
topology: tpu7x:2x2x1
jax: 0.10.0
libtpu: 0.0.40
codegen_flags: <defaults>
</compile_context>

<pallas_src>
import functools

import jax
import jax.numpy as jnp
from jax import lax
from jax.experimental import pallas as pl
from jax.experimental.pallas import tpu as pltpu


def _round_up(x, m):
    return (x + m - 1) // m * m


# ----------------------------- Pallas kernel ------------------------------ #
def _rnn_kernel(num_layers, x_ref, *refs):
    """refs = [WihT_0, WhhT_0, b_0, ..., WihT_{L-1}, WhhT_{L-1}, b_{L-1},
               WfcT, bfc, out_ref, proj_ref(scratch)]

    x_ref   : (S, Bp, Dp)   time-major, zero-padded input
    proj_ref: (S, Bp, Hp)   VMEM scratch; holds the hoisted input projection
                            of the current layer, then (in place) that layer's
                            hidden-state sequence.
    """
    proj_ref = refs[-1]
    out_ref = refs[-2]
    p = refs[:-2]

    S, Bp, Dp = x_ref.shape
    Hp = proj_ref.shape[-1]

    # ---- layer 0 input projection, hoisted out of the recurrence:
    #      one (S*Bp, Dp) @ (Dp, Hp) matmul instead of S tiny ones.
    Wih0 = p[0][...]                                 # (Dp, Hp)
    b0 = p[2][...]                                   # (1, Hp)
    x_all = x_ref[...].reshape(S * Bp, Dp)
    proj_ref[...] = (
        jnp.dot(x_all, Wih0, preferred_element_type=jnp.float32) + b0
    ).reshape(S, Bp, Hp)

    h = jnp.zeros((Bp, Hp), jnp.float32)
    for l in range(num_layers):
        if l > 0:
            # Hoisted input projection for layer l: consumes the previous
            # layer's full hidden-state sequence in one big matmul.
            WihT = p[3 * l][...]                     # (Hp, Hp)
            b = p[3 * l + 2][...]                    # (1, Hp)
            seq = proj_ref[...].reshape(S * Bp, Hp)
            proj_ref[...] = (
                jnp.dot(seq, WihT, preferred_element_type=jnp.float32) + b
            ).reshape(S, Bp, Hp)

        WhhT = p[3 * l + 1][...]                     # (Hp, Hp), per-layer live

        def step(t, h, _WhhT=WhhT):
            h_new = jnp.tanh(
                jnp.dot(h, _WhhT, preferred_element_type=jnp.float32)
                + proj_ref[t])
            # Overwrite the consumed projection slot with this layer's output
            # at time t -> becomes the next layer's input sequence.
            proj_ref[t] = h_new
            return h_new

        # Fully unrolled serial recurrence (S is static and small).
        h = lax.fori_loop(0, S, step, jnp.zeros((Bp, Hp), jnp.float32),
                          unroll=True)

    # fc(out[:, -1, :]) on the last layer's final hidden state.
    WfcT = p[-2][...]                                # (Hp, Op)
    bfc = p[-1][...]                                 # (1, Op)
    out_ref[...] = (
        jnp.dot(h, WfcT, preferred_element_type=jnp.float32) + bfc
    ).astype(out_ref.dtype)


# ------------------------------ wrapper ----------------------------------- #
def rnn_forward(x, params, num_layers):
    """x: (B, S, D_in) batch-first, like the PyTorch module."""
    B, S, D_in = x.shape
    H = params["Whh"][0].shape[0]
    O = params["Wfc"].shape[0]

    # Pad to vreg / MXU friendly shapes: sublane (8) for batch, lane (128)
    # for every feature dim -> unmasked vld/vst and full MXU tiles.
    Bp = _round_up(B, 8)
    Hp = _round_up(H, 128)
    Dp = _round_up(D_in, 128)
    Op = _round_up(O, 128)

    # Time-major, zero-padded input.
    xt = jnp.transpose(x, (1, 0, 2)).astype(jnp.float32)        # (S, B, D_in)
    xt = jnp.pad(xt, ((0, 0), (0, Bp - B), (0, Dp - D_in)))     # (S, Bp, Dp)

    # Pre-transposed, pre-padded weights; biases pre-summed.
    # (In a real model these would be prepared once, outside the call path.)
    flat = []
    for l in range(num_layers):
        d_in = D_in if l == 0 else H
        d_in_p = Dp if l == 0 else Hp
        WihT = jnp.transpose(params["Wih"][l]).astype(jnp.float32)   # (d_in, H)
        WihT = jnp.pad(WihT, ((0, d_in_p - d_in), (0, Hp - H)))
        WhhT = jnp.transpose(params["Whh"][l]).astype(jnp.float32)   # (H, H)
        WhhT = jnp.pad(WhhT, ((0, Hp - H), (0, Hp - H)))
        b = (params["bih"][l] + params["bhh"][l]).astype(jnp.float32)
        b = jnp.pad(b, (0, Hp - H)).reshape(1, Hp)
        flat += [WihT, WhhT, b]
    WfcT = jnp.pad(jnp.transpose(params["Wfc"]).astype(jnp.float32),
                   ((0, Hp - H), (0, Op - O)))                        # (Hp, Op)
    bfc = jnp.pad(params["bfc"].astype(jnp.float32),
                  (0, Op - O)).reshape(1, Op)
    flat += [WfcT, bfc]

    vmem = pl.BlockSpec(memory_space=pltpu.MemorySpace.VMEM)
    kernel = functools.partial(_rnn_kernel, num_layers)

    out_p = pl.pallas_call(
        kernel,
        out_shape=jax.ShapeDtypeStruct((Bp, Op), jnp.float32),
        in_specs=[vmem] * (1 + len(flat)),
        out_specs=vmem,
        scratch_shapes=[pltpu.VMEM((S, Bp, Hp), jnp.float32)],
        compiler_params=pltpu.CompilerParams(
            vmem_limit_bytes=64 * 1024 * 1024),
    )(xt, *flat)

    # Strip padding (lane-dense slab -> true (B, O) output).
    return out_p[:B, :O]


# --------------------------- pure-JAX reference ---------------------------- #
def rnn_reference(x, params, num_layers):
    B, S, _ = x.shape
    H = params["Whh"][0].shape[0]
    h = [jnp.zeros((B, H), jnp.float32) for _ in range(num_layers)]
    last = None
    for t in range(S):
        inp = x[:, t, :]
        for l in range(num_layers):
            h[l] = jnp.tanh(inp @ params["Wih"][l].T + params["bih"][l]
                            + h[l] @ params["Whh"][l].T + params["bhh"][l])
            inp = h[l]
        last = h[-1]
    return last @ params["Wfc"].T + params["bfc"]


# ------------------------------ param init --------------------------------- #
def init_params(key, dim_input, dim_hidden, dim_output, num_layers):
    # Mirror PyTorch nn.RNN / nn.Linear default init: U(-1/sqrt(H), 1/sqrt(H)).
    bound = 1.0 / jnp.sqrt(jnp.float32(dim_hidden))
    params = {"Wih": [], "Whh": [], "bih": [], "bhh": []}
    for l in range(num_layers):
        d_in = dim_input if l == 0 else dim_hidden
        key, k1, k2, k3, k4 = jax.random.split(key, 5)
        params["Wih"].append(jax.random.uniform(k1, (dim_hidden, d_in),
                                                jnp.float32, -bound, bound))
        params["Whh"].append(jax.random.uniform(k2, (dim_hidden, dim_hidden),
                                                jnp.float32, -bound, bound))
        params["bih"].append(jax.random.uniform(k3, (dim_hidden,),
                                                jnp.float32, -bound, bound))
        params["bhh"].append(jax.random.uniform(k4, (dim_hidden,),
                                                jnp.float32, -bound, bound))
    key, k1, k2 = jax.random.split(key, 3)
    params["Wfc"] = jax.random.uniform(k1, (dim_output, dim_hidden),
                                       jnp.float32, -bound, bound)
    params["bfc"] = jax.random.uniform(k2, (dim_output,),
                                       jnp.float32, -bound, bound)
    return params


# --------------------------------- main ------------------------------------ #
if __name__ == "__main__":
    B, S = 2, 8
    dim_input, dim_hidden, dim_output, num_layers = 8, 32, 4, 2

    key = jax.random.PRNGKey(0)
    key, kx = jax.random.split(key)
    x = jax.random.normal(kx, (B, S, dim_input), jnp.float32)

    params = init_params(key, dim_input, dim_hidden, dim_output, num_layers)

    out = rnn_forward(x, params, num_layers)
    out = jax.block_until_ready(out)

    ref = rnn_reference(x, params, num_layers)
    assert out.shape == (B, dim_output), out.shape
    assert jnp.allclose(out, ref, atol=2e-4, rtol=2e-4), (out, ref)

    print("KERNEL_OK")
</pallas_src>

<mosaic_0001>
module attributes {stable_mosaic.version = 11 : i64} {
  func.func @_rnn_kernel(%arg0: memref<8x8x128xf32, #tpu.memory_space<vmem>>, %arg1: memref<128x128xf32, #tpu.memory_space<vmem>>, %arg2: memref<128x128xf32, #tpu.memory_space<vmem>>, %arg3: memref<1x128xf32, #tpu.memory_space<vmem>>, %arg4: memref<128x128xf32, #tpu.memory_space<vmem>>, %arg5: memref<128x128xf32, #tpu.memory_space<vmem>>, %arg6: memref<1x128xf32, #tpu.memory_space<vmem>>, %arg7: memref<128x128xf32, #tpu.memory_space<vmem>>, %arg8: memref<1x128xf32, #tpu.memory_space<vmem>>, %arg9: memref<8x128xf32, #tpu.memory_space<vmem>>, %arg10: memref<8x8x128xf32, #tpu.memory_space<vmem>>) attributes {dimension_semantics = [], scalar_prefetch = 0 : i64, scratch_operands = 1 : i64, tpu.core_type = #tpu.core_type<tc>} {
    %c0 = arith.constant 0 : index
    %c0_0 = arith.constant 0 : index
    %0 = vector.load %arg1[%c0, %c0_0] : memref<128x128xf32, #tpu.memory_space<vmem>>, vector<128x128xf32>
    %c0_1 = arith.constant 0 : index
    %c0_2 = arith.constant 0 : index
    %1 = vector.load %arg3[%c0_1, %c0_2] : memref<1x128xf32, #tpu.memory_space<vmem>>, vector<1x128xf32>
    %c0_3 = arith.constant 0 : index
    %c0_4 = arith.constant 0 : index
    %c0_5 = arith.constant 0 : index
    %2 = vector.load %arg0[%c0_3, %c0_4, %c0_5] : memref<8x8x128xf32, #tpu.memory_space<vmem>>, vector<8x8x128xf32>
    %3 = vector.shape_cast %2 : vector<8x8x128xf32> to vector<64x128xf32>
    %cst = arith.constant dense<0.000000e+00> : vector<64x128xf32>
    %4 = tpu.matmul %3, %0, %cst {dimension_numbers = #tpu.dot_dimension_numbers<[1], [0], [0], [1], [0, 0, 1, 1], [], []>} : vector<64x128xf32>, vector<128x128xf32>, vector<64x128xf32> -> vector<64x128xf32>
    %5 = vector.broadcast %1 : vector<1x128xf32> to vector<64x128xf32>
    %6 = arith.addf %4, %5 : vector<64x128xf32>
    %7 = vector.shape_cast %6 : vector<64x128xf32> to vector<8x8x128xf32>
    %c0_6 = arith.constant 0 : index
    %c0_7 = arith.constant 0 : index
    %c0_8 = arith.constant 0 : index
    %8 = vector.load %arg10[%c0_6, %c0_7, %c0_8] : memref<8x8x128xf32, #tpu.memory_space<vmem>>, vector<8x8x128xf32>
    tpu.vector_store %arg10[%c0_6, %c0_7, %c0_8], %7 {strides = array<i32>} : memref<8x8x128xf32, #tpu.memory_space<vmem>>, vector<8x8x128xf32>,
    %c0_9 = arith.constant 0 : index
    %c0_10 = arith.constant 0 : index
    %9 = vector.load %arg2[%c0_9, %c0_10] : memref<128x128xf32, #tpu.memory_space<vmem>>, vector<128x128xf32>
    %cst_11 = arith.constant 0.000000e+00 : f32
    %10 = vector.broadcast %cst_11 : f32 to vector<8x128xf32>
    %c0_i32 = arith.constant 0 : i32
    %cst_12 = arith.constant dense<0.000000e+00> : vector<8x128xf32>
    %11 = tpu.matmul %10, %9, %cst_12 {dimension_numbers = #tpu.dot_dimension_numbers<[1], [0], [0], [1], [0, 0, 1, 1], [], []>} : vector<8x128xf32>, vector<128x128xf32>, vector<8x128xf32> -> vector<8x128xf32>
    %12 = arith.index_cast %c0_i32 : i32 to index
    %c0_13 = arith.constant 0 : index
    %c0_14 = arith.constant 0 : index
    %13 = vector.load %arg10[%12, %c0_13, %c0_14] : memref<8x8x128xf32, #tpu.memory_space<vmem>>, vector<1x8x128xf32>
    %14 = vector.shape_cast %13 : vector<1x8x128xf32> to vector<8x128xf32>
    %15 = arith.addf %11, %14 : vector<8x128xf32>
    %16 = math.tanh %15 : vector<8x128xf32>
    %17 = arith.index_cast %c0_i32 : i32 to index
    %c0_15 = arith.constant 0 : index
    %c0_16 = arith.constant 0 : index
    %18 = vector.load %arg10[%17, %c0_15, %c0_16] : memref<8x8x128xf32, #tpu.memory_space<vmem>>, vector<1x8x128xf32>
    %19 = vector.shape_cast %18 : vector<1x8x128xf32> to vector<8x128xf32>
    %20 = vector.shape_cast %16 : vector<8x128xf32> to vector<1x8x128xf32>
    tpu.vector_store %arg10[%17, %c0_15, %c0_16], %20 {strides = array<i32>} : memref<8x8x128xf32, #tpu.memory_space<vmem>>, vector<1x8x128xf32>,
    %c1_i32 = arith.constant 1 : i32
    %cst_17 = arith.constant dense<0.000000e+00> : vector<8x128xf32>
    %21 = tpu.matmul %16, %9, %cst_17 {dimension_numbers = #tpu.dot_dimension_numbers<[1], [0], [0], [1], [0, 0, 1, 1], [], []>} : vector<8x128xf32>, vector<128x128xf32>, vector<8x128xf32> -> vector<8x128xf32>
    %22 = arith.index_cast %c1_i32 : i32 to index
    %c0_18 = arith.constant 0 : index
    %c0_19 = arith.constant 0 : index
    %23 = vector.load %arg10[%22, %c0_18, %c0_19] : memref<8x8x128xf32, #tpu.memory_space<vmem>>, vector<1x8x128xf32>
    %24 = vector.shape_cast %23 : vector<1x8x128xf32> to vector<8x128xf32>
    %25 = arith.addf %21, %24 : vector<8x128xf32>
    %26 = math.tanh %25 : vector<8x128xf32>
    %27 = arith.index_cast %c1_i32 : i32 to index
    %c0_20 = arith.constant 0 : index
    %c0_21 = arith.constant 0 : index
    %28 = vector.load %arg10[%27, %c0_20, %c0_21] : memref<8x8x128xf32, #tpu.memory_space<vmem>>, vector<1x8x128xf32>
    %29 = vector.shape_cast %28 : vector<1x8x128xf32> to vector<8x128xf32>
    %30 = vector.shape_cast %26 : vector<8x128xf32> to vector<1x8x128xf32>
    tpu.vector_store %arg10[%27, %c0_20, %c0_21], %30 {strides = array<i32>} : memref<8x8x128xf32, #tpu.memory_space<vmem>>, vector<1x8x128xf32>,
    %c2_i32 = arith.constant 2 : i32
    %cst_22 = arith.constant dense<0.000000e+00> : vector<8x128xf32>
    %31 = tpu.matmul %26, %9, %cst_22 {dimension_numbers = #tpu.dot_dimension_numbers<[1], [0], [0], [1], [0, 0, 1, 1], [], []>} : vector<8x128xf32>, vector<128x128xf32>, vector<8x128xf32> -> vector<8x128xf32>
    %32 = arith.index_cast %c2_i32 : i32 to index
    %c0_23 = arith.constant 0 : index
    %c0_24 = arith.constant 0 : index
    %33 = vector.load %arg10[%32, %c0_23, %c0_24] : memref<8x8x128xf32, #tpu.memory_space<vmem>>, vector<1x8x128xf32>
    %34 = vector.shape_cast %33 : vector<1x8x128xf32> to vector<8x128xf32>
    %35 = arith.addf %31, %34 : vector<8x128xf32>
    %36 = math.tanh %35 : vector<8x128xf32>
    %37 = arith.index_cast %c2_i32 : i32 to index
    %c0_25 = arith.constant 0 : index
    %c0_26 = arith.constant 0 : index
    %38 = vector.load %arg10[%37, %c0_25, %c0_26] : memref<8x8x128xf32, #tpu.memory_space<vmem>>, vector<1x8x128xf32>
    %39 = vector.shape_cast %38 : vector<1x8x128xf32> to vector<8x128xf32>
    %40 = vector.shape_cast %36 : vector<8x128xf32> to vector<1x8x128xf32>
    tpu.vector_store %arg10[%37, %c0_25, %c0_26], %40 {strides = array<i32>} : memref<8x8x128xf32, #tpu.memory_space<vmem>>, vector<1x8x128xf32>,
    %c3_i32 = arith.constant 3 : i32
    %cst_27 = arith.constant dense<0.000000e+00> : vector<8x128xf32>
    %41 = tpu.matmul %36, %9, %cst_27 {dimension_numbers = #tpu.dot_dimension_numbers<[1], [0], [0], [1], [0, 0, 1, 1], [], []>} : vector<8x128xf32>, vector<128x128xf32>, vector<8x128xf32> -> vector<8x128xf32>
    %42 = arith.index_cast %c3_i32 : i32 to index
    %c0_28 = arith.constant 0 : index
    %c0_29 = arith.constant 0 : index
    %43 = vector.load %arg10[%42, %c0_28, %c0_29] : memref<8x8x128xf32, #tpu.memory_space<vmem>>, vector<1x8x128xf32>
    %44 = vector.shape_cast %43 : vector<1x8x128xf32> to vector<8x128xf32>
    %45 = arith.addf %41, %44 : vector<8x128xf32>
    %46 = math.tanh %45 : vector<8x128xf32>
    %47 = arith.index_cast %c3_i32 : i32 to index
    %c0_30 = arith.constant 0 : index
    %c0_31 = arith.constant 0 : index
    %48 = vector.load %arg10[%47, %c0_30, %c0_31] : memref<8x8x128xf32, #tpu.memory_space<vmem>>, vector<1x8x128xf32>
    %49 = vector.shape_cast %48 : vector<1x8x128xf32> to vector<8x128xf32>
    %50 = vector.shape_cast %46 : vector<8x128xf32> to vector<1x8x128xf32>
    tpu.vector_store %arg10[%47, %c0_30, %c0_31], %50 {strides = array<i32>} : memref<8x8x128xf32, #tpu.memory_space<vmem>>, vector<1x8x128xf32>,
    %c4_i32 = arith.constant 4 : i32
    %cst_32 = arith.constant dense<0.000000e+00> : vector<8x128xf32>
    %51 = tpu.matmul %46, %9, %cst_32 {dimension_numbers = #tpu.dot_dimension_numbers<[1], [0], [0], [1], [0, 0, 1, 1], [], []>} : vector<8x128xf32>, vector<128x128xf32>, vector<8x128xf32> -> vector<8x128xf32>
    %52 = arith.index_cast %c4_i32 : i32 to index
    %c0_33 = arith.constant 0 : index
    %c0_34 = arith.constant 0 : index
    %53 = vector.load %arg10[%52, %c0_33, %c0_34] : memref<8x8x128xf32, #tpu.memory_space<vmem>>, vector<1x8x128xf32>
    %54 = vector.shape_cast %53 : vector<1x8x128xf32> to vector<8x128xf32>
    %55 = arith.addf %51, %54 : vector<8x128xf32>
    %56 = math.tanh %55 : vector<8x128xf32>
    %57 = arith.index_cast %c4_i32 : i32 to index
    %c0_35 = arith.constant 0 : index
    %c0_36 = arith.constant 0 : index
    %58 = vector.load %arg10[%57, %c0_35, %c0_36] : memref<8x8x128xf32, #tpu.memory_space<vmem>>, vector<1x8x128xf32>
    %59 = vector.shape_cast %58 : vector<1x8x128xf32> to vector<8x128xf32>
    %60 = vector.shape_cast %56 : vector<8x128xf32> to vector<1x8x128xf32>
    tpu.vector_store %arg10[%57, %c0_35, %c0_36], %60 {strides = array<i32>} : memref<8x8x128xf32, #tpu.memory_space<vmem>>, vector<1x8x128xf32>,
    %c5_i32 = arith.constant 5 : i32
    %cst_37 = arith.constant dense<0.000000e+00> : vector<8x128xf32>
    %61 = tpu.matmul %56, %9, %cst_37 {dimension_numbers = #tpu.dot_dimension_numbers<[1], [0], [0], [1], [0, 0, 1, 1], [], []>} : vector<8x128xf32>, vector<128x128xf32>, vector<8x128xf32> -> vector<8x128xf32>
    %62 = arith.index_cast %c5_i32 : i32 to index
    %c0_38 = arith.constant 0 : index
    %c0_39 = arith.constant 0 : index
    %63 = vector.load %arg10[%62, %c0_38, %c0_39] : memref<8x8x128xf32, #tpu.memory_space<vmem>>, vector<1x8x128xf32>
    %64 = vector.shape_cast %63 : vector<1x8x128xf32> to vector<8x128xf32>
    %65 = arith.addf %61, %64 : vector<8x128xf32>
    %66 = math.tanh %65 : vector<8x128xf32>
    %67 = arith.index_cast %c5_i32 : i32 to index
    %c0_40 = arith.constant 0 : index
    %c0_41 = arith.constant 0 : index
    %68 = vector.load %arg10[%67, %c0_40, %c0_41] : memref<8x8x128xf32, #tpu.memory_space<vmem>>, vector<1x8x128xf32>
    %69 = vector.shape_cast %68 : vector<1x8x128xf32> to vector<8x128xf32>
    %70 = vector.shape_cast %66 : vector<8x128xf32> to vector<1x8x128xf32>
    tpu.vector_store %arg10[%67, %c0_40, %c0_41], %70 {strides = array<i32>} : memref<8x8x128xf32, #tpu.memory_space<vmem>>, vector<1x8x128xf32>,
    %c6_i32 = arith.constant 6 : i32
    %cst_42 = arith.constant dense<0.000000e+00> : vector<8x128xf32>
    %71 = tpu.matmul %66, %9, %cst_42 {dimension_numbers = #tpu.dot_dimension_numbers<[1], [0], [0], [1], [0, 0, 1, 1], [], []>} : vector<8x128xf32>, vector<128x128xf32>, vector<8x128xf32> -> vector<8x128xf32>
    %72 = arith.index_cast %c6_i32 : i32 to index
    %c0_43 = arith.constant 0 : index
    %c0_44 = arith.constant 0 : index
    %73 = vector.load %arg10[%72, %c0_43, %c0_44] : memref<8x8x128xf32, #tpu.memory_space<vmem>>, vector<1x8x128xf32>
    %74 = vector.shape_cast %73 : vector<1x8x128xf32> to vector<8x128xf32>
    %75 = arith.addf %71, %74 : vector<8x128xf32>
    %76 = math.tanh %75 : vector<8x128xf32>
    %77 = arith.index_cast %c6_i32 : i32 to index
    %c0_45 = arith.constant 0 : index
    %c0_46 = arith.constant 0 : index
    %78 = vector.load %arg10[%77, %c0_45, %c0_46] : memref<8x8x128xf32, #tpu.memory_space<vmem>>, vector<1x8x128xf32>
    %79 = vector.shape_cast %78 : vector<1x8x128xf32> to vector<8x128xf32>
    %80 = vector.shape_cast %76 : vector<8x128xf32> to vector<1x8x128xf32>
    tpu.vector_store %arg10[%77, %c0_45, %c0_46], %80 {strides = array<i32>} : memref<8x8x128xf32, #tpu.memory_space<vmem>>, vector<1x8x128xf32>,
    %c7_i32 = arith.constant 7 : i32
    %cst_47 = arith.constant dense<0.000000e+00> : vector<8x128xf32>
    %81 = tpu.matmul %76, %9, %cst_47 {dimension_numbers = #tpu.dot_dimension_numbers<[1], [0], [0], [1], [0, 0, 1, 1], [], []>} : vector<8x128xf32>, vector<128x128xf32>, vector<8x128xf32> -> vector<8x128xf32>
    %82 = arith.index_cast %c7_i32 : i32 to index
    %c0_48 = arith.constant 0 : index
    %c0_49 = arith.constant 0 : index
    %83 = vector.load %arg10[%82, %c0_48, %c0_49] : memref<8x8x128xf32, #tpu.memory_space<vmem>>, vector<1x8x128xf32>
    %84 = vector.shape_cast %83 : vector<1x8x128xf32> to vector<8x128xf32>
    %85 = arith.addf %81, %84 : vector<8x128xf32>
    %86 = math.tanh %85 : vector<8x128xf32>
    %87 = arith.index_cast %c7_i32 : i32 to index
    %c0_50 = arith.constant 0 : index
    %c0_51 = arith.constant 0 : index
    %88 = vector.load %arg10[%87, %c0_50, %c0_51] : memref<8x8x128xf32, #tpu.memory_space<vmem>>, vector<1x8x128xf32>
    %89 = vector.shape_cast %88 : vector<1x8x128xf32> to vector<8x128xf32>
    %90 = vector.shape_cast %86 : vector<8x128xf32> to vector<1x8x128xf32>
    tpu.vector_store %arg10[%87, %c0_50, %c0_51], %90 {strides = array<i32>} : memref<8x8x128xf32, #tpu.memory_space<vmem>>, vector<1x8x128xf32>,
    %c8_i32 = arith.constant 8 : i32
    %c0_52 = arith.constant 0 : index
    %c0_53 = arith.constant 0 : index
    %91 = vector.load %arg4[%c0_52, %c0_53] : memref<128x128xf32, #tpu.memory_space<vmem>>, vector<128x128xf32>
    %c0_54 = arith.constant 0 : index
    %c0_55 = arith.constant 0 : index
    %92 = vector.load %arg6[%c0_54, %c0_55] : memref<1x128xf32, #tpu.memory_space<vmem>>, vector<1x128xf32>
    %c0_56 = arith.constant 0 : index
    %c0_57 = arith.constant 0 : index
    %c0_58 = arith.constant 0 : index
    %93 = vector.load %arg10[%c0_56, %c0_57, %c0_58] : memref<8x8x128xf32, #tpu.memory_space<vmem>>, vector<8x8x128xf32>
    %94 = vector.shape_cast %93 : vector<8x8x128xf32> to vector<64x128xf32>
    %cst_59 = arith.constant dense<0.000000e+00> : vector<64x128xf32>
    %95 = tpu.matmul %94, %91, %cst_59 {dimension_numbers = #tpu.dot_dimension_numbers<[1], [0], [0], [1], [0, 0, 1, 1], [], []>} : vector<64x128xf32>, vector<128x128xf32>, vector<64x128xf32> -> vector<64x128xf32>
    %96 = vector.broadcast %92 : vector<1x128xf32> to vector<64x128xf32>
    %97 = arith.addf %95, %96 : vector<64x128xf32>
    %98 = vector.shape_cast %97 : vector<64x128xf32> to vector<8x8x128xf32>
    %c0_60 = arith.constant 0 : index
    %c0_61 = arith.constant 0 : index
    %c0_62 = arith.constant 0 : index
    %99 = vector.load %arg10[%c0_60, %c0_61, %c0_62] : memref<8x8x128xf32, #tpu.memory_space<vmem>>, vector<8x8x128xf32>
    tpu.vector_store %arg10[%c0_60, %c0_61, %c0_62], %98 {strides = array<i32>} : memref<8x8x128xf32, #tpu.memory_space<vmem>>, vector<8x8x128xf32>,
    %c0_63 = arith.constant 0 : index
    %c0_64 = arith.constant 0 : index
    %100 = vector.load %arg5[%c0_63, %c0_64] : memref<128x128xf32, #tpu.memory_space<vmem>>, vector<128x128xf32>
    %cst_65 = arith.constant 0.000000e+00 : f32
    %101 = vector.broadcast %cst_65 : f32 to vector<8x128xf32>
    %c0_i32_66 = arith.constant 0 : i32
    %cst_67 = arith.constant dense<0.000000e+00> : vector<8x128xf32>
    %102 = tpu.matmul %101, %100, %cst_67 {dimension_numbers = #tpu.dot_dimension_numbers<[1], [0], [0], [1], [0, 0, 1, 1], [], []>} : vector<8x128xf32>, vector<128x128xf32>, vector<8x128xf32> -> vector<8x128xf32>
    %103 = arith.index_cast %c0_i32_66 : i32 to index
    %c0_68 = arith.constant 0 : index
    %c0_69 = arith.constant 0 : index
    %104 = vector.load %arg10[%103, %c0_68, %c0_69] : memref<8x8x128xf32, #tpu.memory_space<vmem>>, vector<1x8x128xf32>
    %105 = vector.shape_cast %104 : vector<1x8x128xf32> to vector<8x128xf32>
    %106 = arith.addf %102, %105 : vector<8x128xf32>
    %107 = math.tanh %106 : vector<8x128xf32>
    %108 = arith.index_cast %c0_i32_66 : i32 to index
    %c0_70 = arith.constant 0 : index
    %c0_71 = arith.constant 0 : index
    %109 = vector.load %arg10[%108, %c0_70, %c0_71] : memref<8x8x128xf32, #tpu.memory_space<vmem>>, vector<1x8x128xf32>
    %110 = vector.shape_cast %109 : vector<1x8x128xf32> to vector<8x128xf32>
    %111 = vector.shape_cast %107 : vector<8x128xf32> to vector<1x8x128xf32>
    tpu.vector_store %arg10[%108, %c0_70, %c0_71], %111 {strides = array<i32>} : memref<8x8x128xf32, #tpu.memory_space<vmem>>, vector<1x8x128xf32>,
    %c1_i32_72 = arith.constant 1 : i32
    %cst_73 = arith.constant dense<0.000000e+00> : vector<8x128xf32>
    %112 = tpu.matmul %107, %100, %cst_73 {dimension_numbers = #tpu.dot_dimension_numbers<[1], [0], [0], [1], [0, 0, 1, 1], [], []>} : vector<8x128xf32>, vector<128x128xf32>, vector<8x128xf32> -> vector<8x128xf32>
    %113 = arith.index_cast %c1_i32_72 : i32 to index
    %c0_74 = arith.constant 0 : index
    %c0_75 = arith.constant 0 : index
    %114 = vector.load %arg10[%113, %c0_74, %c0_75] : memref<8x8x128xf32, #tpu.memory_space<vmem>>, vector<1x8x128xf32>
    %115 = vector.shape_cast %114 : vector<1x8x128xf32> to vector<8x128xf32>
    %116 = arith.addf %112, %115 : vector<8x128xf32>
    %117 = math.tanh %116 : vector<8x128xf32>
    %118 = arith.index_cast %c1_i32_72 : i32 to index
    %c0_76 = arith.constant 0 : index
    %c0_77 = arith.constant 0 : index
    %119 = vector.load %arg10[%118, %c0_76, %c0_77] : memref<8x8x128xf32, #tpu.memory_space<vmem>>, vector<1x8x128xf32>
    %120 = vector.shape_cast %119 : vector<1x8x128xf32> to vector<8x128xf32>
    %121 = vector.shape_cast %117 : vector<8x128xf32> to vector<1x8x128xf32>
    tpu.vector_store %arg10[%118, %c0_76, %c0_77], %121 {strides = array<i32>} : memref<8x8x128xf32, #tpu.memory_space<vmem>>, vector<1x8x128xf32>,
    %c2_i32_78 = arith.constant 2 : i32
    %cst_79 = arith.constant dense<0.000000e+00> : vector<8x128xf32>
    %122 = tpu.matmul %117, %100, %cst_79 {dimension_numbers = #tpu.dot_dimension_numbers<[1], [0], [0], [1], [0, 0, 1, 1], [], []>} : vector<8x128xf32>, vector<128x128xf32>, vector<8x128xf32> -> vector<8x128xf32>
    %123 = arith.index_cast %c2_i32_78 : i32 to index
    %c0_80 = arith.constant 0 : index
    %c0_81 = arith.constant 0 : index
    %124 = vector.load %arg10[%123, %c0_80, %c0_81] : memref<8x8x128xf32, #tpu.memory_space<vmem>>, vector<1x8x128xf32>
    %125 = vector.shape_cast %124 : vector<1x8x128xf32> to vector<8x128xf32>
    %126 = arith.addf %122, %125 : vector<8x128xf32>
    %127 = math.tanh %126 : vector<8x128xf32>
    %128 = arith.index_cast %c2_i32_78 : i32 to index
    %c0_82 = arith.constant 0 : index
    %c0_83 = arith.constant 0 : index
    %129 = vector.load %arg10[%128, %c0_82, %c0_83] : memref<8x8x128xf32, #tpu.memory_space<vmem>>, vector<1x8x128xf32>
    %130 = vector.shape_cast %129 : vector<1x8x128xf32> to vector<8x128xf32>
    %131 = vector.shape_cast %127 : vector<8x128xf32> to vector<1x8x128xf32>
    tpu.vector_store %arg10[%128, %c0_82, %c0_83], %131 {strides = array<i32>} : memref<8x8x128xf32, #tpu.memory_space<vmem>>, vector<1x8x128xf32>,
    %c3_i32_84 = arith.constant 3 : i32
    %cst_85 = arith.constant dense<0.000000e+00> : vector<8x128xf32>
    %132 = tpu.matmul %127, %100, %cst_85 {dimension_numbers = #tpu.dot_dimension_numbers<[1], [0], [0], [1], [0, 0, 1, 1], [], []>} : vector<8x128xf32>, vector<128x128xf32>, vector<8x128xf32> -> vector<8x128xf32>
    %133 = arith.index_cast %c3_i32_84 : i32 to index
    %c0_86 = arith.constant 0 : index
    %c0_87 = arith.constant 0 : index
    %134 = vector.load %arg10[%133, %c0_86, %c0_87] : memref<8x8x128xf32, #tpu.memory_space<vmem>>, vector<1x8x128xf32>
    %135 = vector.shape_cast %134 : vector<1x8x128xf32> to vector<8x128xf32>
    %136 = arith.addf %132, %135 : vector<8x128xf32>
    %137 = math.tanh %136 : vector<8x128xf32>
    %138 = arith.index_cast %c3_i32_84 : i32 to index
    %c0_88 = arith.constant 0 : index
    %c0_89 = arith.constant 0 : index
    %139 = vector.load %arg10[%138, %c0_88, %c0_89] : memref<8x8x128xf32, #tpu.memory_space<vmem>>, vector<1x8x128xf32>
    %140 = vector.shape_cast %139 : vector<1x8x128xf32> to vector<8x128xf32>
    %141 = vector.shape_cast %137 : vector<8x128xf32> to vector<1x8x128xf32>
    tpu.vector_store %arg10[%138, %c0_88, %c0_89], %141 {strides = array<i32>} : memref<8x8x128xf32, #tpu.memory_space<vmem>>, vector<1x8x128xf32>,
    %c4_i32_90 = arith.constant 4 : i32
    %cst_91 = arith.constant dense<0.000000e+00> : vector<8x128xf32>
    %142 = tpu.matmul %137, %100, %cst_91 {dimension_numbers = #tpu.dot_dimension_numbers<[1], [0], [0], [1], [0, 0, 1, 1], [], []>} : vector<8x128xf32>, vector<128x128xf32>, vector<8x128xf32> -> vector<8x128xf32>
    %143 = arith.index_cast %c4_i32_90 : i32 to index
    %c0_92 = arith.constant 0 : index
    %c0_93 = arith.constant 0 : index
    %144 = vector.load %arg10[%143, %c0_92, %c0_93] : memref<8x8x128xf32, #tpu.memory_space<vmem>>, vector<1x8x128xf32>
    %145 = vector.shape_cast %144 : vector<1x8x128xf32> to vector<8x128xf32>
    %146 = arith.addf %142, %145 : vector<8x128xf32>
    %147 = math.tanh %146 : vector<8x128xf32>
    %148 = arith.index_cast %c4_i32_90 : i32 to index
    %c0_94 = arith.constant 0 : index
    %c0_95 = arith.constant 0 : index
    %149 = vector.load %arg10[%148, %c0_94, %c0_95] : memref<8x8x128xf32, #tpu.memory_space<vmem>>, vector<1x8x128xf32>
    %150 = vector.shape_cast %149 : vector<1x8x128xf32> to vector<8x128xf32>
    %151 = vector.shape_cast %147 : vector<8x128xf32> to vector<1x8x128xf32>
    tpu.vector_store %arg10[%148, %c0_94, %c0_95], %151 {strides = array<i32>} : memref<8x8x128xf32, #tpu.memory_space<vmem>>, vector<1x8x128xf32>,
    %c5_i32_96 = arith.constant 5 : i32
    %cst_97 = arith.constant dense<0.000000e+00> : vector<8x128xf32>
    %152 = tpu.matmul %147, %100, %cst_97 {dimension_numbers = #tpu.dot_dimension_numbers<[1], [0], [0], [1], [0, 0, 1, 1], [], []>} : vector<8x128xf32>, vector<128x128xf32>, vector<8x128xf32> -> vector<8x128xf32>
    %153 = arith.index_cast %c5_i32_96 : i32 to index
    %c0_98 = arith.constant 0 : index
    %c0_99 = arith.constant 0 : index
    %154 = vector.load %arg10[%153, %c0_98, %c0_99] : memref<8x8x128xf32, #tpu.memory_space<vmem>>, vector<1x8x128xf32>
    %155 = vector.shape_cast %154 : vector<1x8x128xf32> to vector<8x128xf32>
    %156 = arith.addf %152, %155 : vector<8x128xf32>
    %157 = math.tanh %156 : vector<8x128xf32>
    %158 = arith.index_cast %c5_i32_96 : i32 to index
    %c0_100 = arith.constant 0 : index
    %c0_101 = arith.constant 0 : index
    %159 = vector.load %arg10[%158, %c0_100, %c0_101] : memref<8x8x128xf32, #tpu.memory_space<vmem>>, vector<1x8x128xf32>
    %160 = vector.shape_cast %159 : vector<1x8x128xf32> to vector<8x128xf32>
    %161 = vector.shape_cast %157 : vector<8x128xf32> to vector<1x8x128xf32>
    tpu.vector_store %arg10[%158, %c0_100, %c0_101], %161 {strides = array<i32>} : memref<8x8x128xf32, #tpu.memory_space<vmem>>, vector<1x8x128xf32>,
    %c6_i32_102 = arith.constant 6 : i32
    %cst_103 = arith.constant dense<0.000000e+00> : vector<8x128xf32>
    %162 = tpu.matmul %157, %100, %cst_103 {dimension_numbers = #tpu.dot_dimension_numbers<[1], [0], [0], [1], [0, 0, 1, 1], [], []>} : vector<8x128xf32>, vector<128x128xf32>, vector<8x128xf32> -> vector<8x128xf32>
    %163 = arith.index_cast %c6_i32_102 : i32 to index
    %c0_104 = arith.constant 0 : index
    %c0_105 = arith.constant 0 : index
    %164 = vector.load %arg10[%163, %c0_104, %c0_105] : memref<8x8x128xf32, #tpu.memory_space<vmem>>, vector<1x8x128xf32>
    %165 = vector.shape_cast %164 : vector<1x8x128xf32> to vector<8x128xf32>
    %166 = arith.addf %162, %165 : vector<8x128xf32>
    %167 = math.tanh %166 : vector<8x128xf32>
    %168 = arith.index_cast %c6_i32_102 : i32 to index
    %c0_106 = arith.constant 0 : index
    %c0_107 = arith.constant 0 : index
    %169 = vector.load %arg10[%168, %c0_106, %c0_107] : memref<8x8x128xf32, #tpu.memory_space<vmem>>, vector<1x8x128xf32>
    %170 = vector.shape_cast %169 : vector<1x8x128xf32> to vector<8x128xf32>
    %171 = vector.shape_cast %167 : vector<8x128xf32> to vector<1x8x128xf32>
    tpu.vector_store %arg10[%168, %c0_106, %c0_107], %171 {strides = array<i32>} : memref<8x8x128xf32, #tpu.memory_space<vmem>>, vector<1x8x128xf32>,
    %c7_i32_108 = arith.constant 7 : i32
    %cst_109 = arith.constant dense<0.000000e+00> : vector<8x128xf32>
    %172 = tpu.matmul %167, %100, %cst_109 {dimension_numbers = #tpu.dot_dimension_numbers<[1], [0], [0], [1], [0, 0, 1, 1], [], []>} : vector<8x128xf32>, vector<128x128xf32>, vector<8x128xf32> -> vector<8x128xf32>
    %173 = arith.index_cast %c7_i32_108 : i32 to index
    %c0_110 = arith.constant 0 : index
    %c0_111 = arith.constant 0 : index
    %174 = vector.load %arg10[%173, %c0_110, %c0_111] : memref<8x8x128xf32, #tpu.memory_space<vmem>>, vector<1x8x128xf32>
    %175 = vector.shape_cast %174 : vector<1x8x128xf32> to vector<8x128xf32>
    %176 = arith.addf %172, %175 : vector<8x128xf32>
    %177 = math.tanh %176 : vector<8x128xf32>
    %178 = arith.index_cast %c7_i32_108 : i32 to index
    %c0_112 = arith.constant 0 : index
    %c0_113 = arith.constant 0 : index
    %179 = vector.load %arg10[%178, %c0_112, %c0_113] : memref<8x8x128xf32, #tpu.memory_space<vmem>>, vector<1x8x128xf32>
    %180 = vector.shape_cast %179 : vector<1x8x128xf32> to vector<8x128xf32>
    %181 = vector.shape_cast %177 : vector<8x128xf32> to vector<1x8x128xf32>
    tpu.vector_store %arg10[%178, %c0_112, %c0_113], %181 {strides = array<i32>} : memref<8x8x128xf32, #tpu.memory_space<vmem>>, vector<1x8x128xf32>,
    %c8_i32_114 = arith.constant 8 : i32
    %c0_115 = arith.constant 0 : index
    %c0_116 = arith.constant 0 : index
    %182 = vector.load %arg7[%c0_115, %c0_116] : memref<128x128xf32, #tpu.memory_space<vmem>>, vector<128x128xf32>
    %c0_117 = arith.constant 0 : index
    %c0_118 = arith.constant 0 : index
    %183 = vector.load %arg8[%c0_117, %c0_118] : memref<1x128xf32, #tpu.memory_space<vmem>>, vector<1x128xf32>
    %cst_119 = arith.constant dense<0.000000e+00> : vector<8x128xf32>
    %184 = tpu.matmul %177, %182, %cst_119 {dimension_numbers = #tpu.dot_dimension_numbers<[1], [0], [0], [1], [0, 0, 1, 1], [], []>} : vector<8x128xf32>, vector<128x128xf32>, vector<8x128xf32> -> vector<8x128xf32>
    %185 = vector.broadcast %183 : vector<1x128xf32> to vector<8x128xf32>
    %186 = arith.addf %184, %185 : vector<8x128xf32>
    %c0_120 = arith.constant 0 : index
    %c0_121 = arith.constant 0 : index
    %187 = vector.load %arg9[%c0_120, %c0_121] : memref<8x128xf32, #tpu.memory_space<vmem>>, vector<8x128xf32>
    tpu.vector_store %arg9[%c0_120, %c0_121], %186 {strides = array<i32>} : memref<8x128xf32, #tpu.memory_space<vmem>>, vector<8x128xf32>,
    return
  }
}

</mosaic_0001>

<bundles_post_ra>
// kernel: tpu_custom_call.1
= control target key start
LH: loop header
LB: loop body
LE: loop exit
PB: predicated region body
PF: predicated region fallthrough
CT: control target
= control target key end

     0   :  { %14 = vsyncpa [#allocation4], 0  ;;  %s4161_s0 = inlined_call_operand.hbm [shape: f32[8,8,128], index: 0, kind: input, shape index: {}]   ;;  %s4162_s1 = inlined_call_operand.hbm [shape: f32[128,128], index: 1, kind: input, shape index: {}]   ;;  %s4163_s2 = inlined_call_operand.hbm [shape: f32[128,128], index: 2, kind: input, shape index: {}]   ;;  %s4164_s3 = inlined_call_operand.hbm [shape: f32[1,128], index: 3, kind: input, shape index: {}]   ;;  %s4165_s4 = inlined_call_operand.hbm [shape: f32[128,128], index: 4, kind: input, shape index: {}]   ;;  %s4166_s5 = inlined_call_operand.hbm [shape: f32[128,128], index: 5, kind: input, shape index: {}]   ;;  %s4167_s6 = inlined_call_operand.hbm [shape: f32[1,128], index: 6, kind: input, shape index: {}]   ;;  %s4168_s7 = inlined_call_operand.hbm [shape: f32[128,128], index: 7, kind: input, shape index: {}]   ;;  %s4169_s8 = inlined_call_operand.hbm [shape: f32[1,128], index: 8, kind: input, shape index: {}]   ;;  %s4170_s9 = inlined_call_operand.hbm [shape: f32[8,128], index: 9, kind: output, shape index: {}]  }
   0x1   :  { %15 = vsyncpa [#allocation7], 0 }
   0x2   :  { %16 = vsyncpa [#allocation10], 0 }
   0x3   :  { %17 = vsyncpa [#allocation13], 0 }
   0x4   :  { %18 = vsyncpa [#allocation16], 0 }
   0x5   :  { %19 = vsyncpa [#allocation5], 0  ;;  %s3531_s30 = smov [#allocation6]   ;;  %s3532_s11 = smov [#allocation9]  }
   0x6   :  { %s37_s10 = sshll.u32 %s3531_s30, 4  ;;  %s62_s12 = sshll.u32 %s3532_s11, 4  ;;  %s38_s10 = int_to_ptr.vmem [resolvable:$true] %s37_s10  ;;  %s3596_s12 = int_to_ptr.vmem [resolvable:$true] %s62_s12 }
   0x7   :  { %s3299_s15 = scalar_lea.hbm %s4162_s1, 2048 }
   0x8   :  { %p3300_p0 = scmp.ne.s32.totalorder %s4162_s1, %s3299_s15  ;;  %p3303_p1 = scmp.lt.u32.totalorder %s3299_s15, %s4162_s1 }
   0xa   :  { %p3305_p2 = pnand %p3303_p1, %p3300_p0 }
   0xc   :  { %3308 = shalt.err (!%p3305_p2)
}
   0xd   :  { %s3309_s20 = scalar_lea.vmem %s38_s10, 2048  ;;  %p3314_p4 = scmp.lt.s32.totalorder %s38_s10, %s38_s10 }
   0xe   :  { %p3310_p3 = scmp.ne.s32.totalorder %s38_s10, %s3309_s20  ;;  %p3315_p5 = scmp.lt.s32.totalorder %s3309_s20, %s3309_s20 }
  0x10   :  { %p3316_p6 = por %p3315_p5, %p3314_p4 }
  0x12   :  { %p3317_p7 = pnand %p3316_p6, %p3310_p3 }
  0x14   :  { %3320 = shalt.err (!%p3317_p7)
}
  0x15   :  { %s3533_s21 = smov 128   ;;  %s3534_s22 = smov 8  }
  0x16   :  { %43 = dma.hbm_to_vmem [thread:$0]  %s4162_s1, 2048, %s38_s10, [#allocation7], %s3533_s21, %s3533_s21, %s3534_s22  }
  0x17   :  { %s3321_s27 = scalar_lea.hbm %s4164_s3, 16 }
  0x18   :  { %p3322_p8 = scmp.ne.s32.totalorder %s4164_s3, %s3321_s27  ;;  %p3325_p9 = scmp.lt.u32.totalorder %s3321_s27, %s4164_s3 }
  0x1a   :  { %p3327_p10 = pnand %p3325_p9, %p3322_p8 }
  0x1c   :  { %3330 = shalt.err (!%p3327_p10)
}
  0x1d   :  { %s3331_s13 = scalar_lea.vmem %s3596_s12, 16  ;;  %s3335_s1 = scalar_lea.vmem %s3596_s12, 32 }
  0x1e   :  { %p3332_p11 = scmp.ne.s32.totalorder %s3596_s12, %s3331_s13  ;;  %p3336_p12 = scmp.lt.s32.totalorder %s3596_s12, %s3596_s12 }
  0x1f   :  { %p3337_p13 = scmp.lt.s32.totalorder %s3335_s1, %s3331_s13 }
  0x21   :  { %p3338_p0 = por %p3337_p13, %p3336_p12 }
  0x23   :  { %p3339_p1 = pnand %p3338_p0, %p3332_p11 }
  0x25   :  { %3342 = shalt.err (!%p3339_p1)
}
  0x26   :  { %65 = dma.hbm_to_vmem [thread:$0]  %s4164_s3, 16, %s3596_s12, [#allocation10]  }
  0x27   :  { %s3535_s15 = smov [#allocation12]   ;;  %s3536_s17 = smov [#allocation15]  }
  0x28   :  { %s83_s16 = sshll.u32 %s3535_s15, 4  ;;  %s105_s18 = sshll.u32 %s3536_s17, 4  ;;  %s84_s16 = int_to_ptr.vmem [resolvable:$true] %s83_s16  ;;  %s3631_s18 = int_to_ptr.vmem [resolvable:$true] %s105_s18 }
  0x29   :  { %s3343_s23 = scalar_lea.hbm %s4166_s5, 2048 }
  0x2a   :  { %p3344_p2 = scmp.ne.s32.totalorder %s4166_s5, %s3343_s23  ;;  %p3347_p3 = scmp.lt.u32.totalorder %s3343_s23, %s4166_s5 }
  0x2c   :  { %p3349_p4 = pnand %p3347_p3, %p3344_p2 }
  0x2e   :  { %3352 = shalt.err (!%p3349_p4)
}
  0x2f   :  { %s3353_s3 = scalar_lea.vmem %s84_s16, 2048  ;;  %p3358_p6 = scmp.lt.s32.totalorder %s84_s16, %s84_s16 }
  0x30   :  { %p3354_p5 = scmp.ne.s32.totalorder %s84_s16, %s3353_s3  ;;  %p3359_p7 = scmp.lt.s32.totalorder %s3353_s3, %s3353_s3 }
  0x32   :  { %p3360_p8 = por %p3359_p7, %p3358_p6 }
  0x34   :  { %p3361_p9 = pnand %p3360_p8, %p3354_p5 }
  0x36   :  { %3364 = shalt.err (!%p3361_p9)
}
  0x37   :  { %89 = dma.hbm_to_vmem [thread:$0]  %s4166_s5, 2048, %s84_s16, [#allocation13], %s3533_s21, %s3533_s21, %s3534_s22  }
  0x38   :  { %s3365_s11 = scalar_lea.hbm %s4168_s7, 2048 }
  0x39   :  { %p3366_p10 = scmp.ne.s32.totalorder %s4168_s7, %s3365_s11  ;;  %p3369_p11 = scmp.lt.u32.totalorder %s3365_s11, %s4168_s7 }
  0x3b   :  { %p3371_p12 = pnand %p3369_p11, %p3366_p10 }
  0x3d   :  { %3374 = shalt.err (!%p3371_p12)
}
  0x3e   :  { %s3375_s15 = scalar_lea.vmem %s3631_s18, 2048  ;;  %p3380_p0 = scmp.lt.s32.totalorder %s3631_s18, %s3631_s18 }
  0x3f   :  { %p3376_p13 = scmp.ne.s32.totalorder %s3631_s18, %s3375_s15  ;;  %p3381_p1 = scmp.lt.s32.totalorder %s3375_s15, %s3375_s15 }
  0x41   :  { %p3382_p2 = por %p3381_p1, %p3380_p0 }
  0x43   :  { %p3383_p3 = pnand %p3382_p2, %p3376_p13 }
  0x45   :  { %3386 = shalt.err (!%p3383_p3)
}
  0x46   :  { %111 = dma.hbm_to_vmem [thread:$0]  %s4168_s7, 2048, %s3631_s18, [#allocation16], %s3533_s21, %s3533_s21, %s3534_s22  }
  0x47   :  { %s3537_s17 = smov [#allocation3]   ;;  %s3538_s20 = smov [#allocation8]  }
  0x48   :  { %s25_s19 = sshll.u32 %s3537_s17, 4  ;;  %s49_s23 = sshll.u32 %s3538_s20, 4  ;;  %s26_s19 = int_to_ptr.vmem [resolvable:$true] %s25_s19  ;;  %s3668_s23 = int_to_ptr.vmem [resolvable:$true] %s49_s23 }
  0x49   :  { %s3387_s26 = scalar_lea.hbm %s4161_s0, 1024 }
  0x4a   :  { %p3388_p4 = scmp.ne.s32.totalorder %s4161_s0, %s3387_s26  ;;  %p3391_p5 = scmp.lt.u32.totalorder %s3387_s26, %s4161_s0 }
  0x4c   :  { %p3393_p6 = pnand %p3391_p5, %p3388_p4 }
  0x4e   :  { %3396 = shalt.err (!%p3393_p6)
}
  0x4f   :  { %s3397_s7 = scalar_lea.vmem %s26_s19, 1024  ;;  %p3402_p8 = scmp.lt.s32.totalorder %s26_s19, %s26_s19 }
  0x50   :  { %p3398_p7 = scmp.ne.s32.totalorder %s26_s19, %s3397_s7  ;;  %p3403_p9 = scmp.lt.s32.totalorder %s3397_s7, %s3397_s7 }
  0x52   :  { %p3404_p10 = por %p3403_p9, %p3402_p8 }
  0x54   :  { %p3405_p11 = pnand %p3404_p10, %p3398_p7 }
  0x56   :  { %3408 = shalt.err (!%p3405_p11)
}
  0x57   :  { %31 = dma.hbm_to_vmem [thread:$0]  %s4161_s0, 1024, %s26_s19, [#allocation4], %s3533_s21, %s3533_s21, %s3534_s22  }
  0x58   :  { %s3409_s13 = scalar_lea.hbm %s4163_s2, 2048 }
  0x59   :  { %p3410_p12 = scmp.ne.s32.totalorder %s4163_s2, %s3409_s13  ;;  %p3413_p13 = scmp.lt.u32.totalorder %s3409_s13, %s4163_s2 }
  0x5b   :  { %p3415_p0 = pnand %p3413_p13, %p3410_p12 }
  0x5d   :  { %3418 = shalt.err (!%p3415_p0)
}
  0x5e   :  { %s3419_s5 = scalar_lea.vmem %s3668_s23, 2048  ;;  %p3424_p2 = scmp.lt.s32.totalorder %s3668_s23, %s3668_s23 }
  0x5f   :  { %p3420_p1 = scmp.ne.s32.totalorder %s3668_s23, %s3419_s5  ;;  %p3425_p3 = scmp.lt.s32.totalorder %s3419_s5, %s3419_s5 }
  0x61   :  { %p3426_p4 = por %p3425_p3, %p3424_p2 }
  0x63   :  { %p3427_p5 = pnand %p3426_p4, %p3420_p1 }
  0x65   :  { %3430 = shalt.err (!%p3427_p5)
}
  0x66   :  { %55 = dma.hbm_to_vmem [thread:$0]  %s4163_s2, 2048, %s3668_s23, [#allocation7], %s3533_s21, %s3533_s21, %s3534_s22  }
  0x67   :  { %s3539_s17 = smov [#allocation11]   ;;  %s3540_s20 = smov [#allocation14]  }
  0x68   :  { %s71_s19 = sshll.u32 %s3539_s17, 4  ;;  %s96_s24 = sshll.u32 %s3540_s20, 4  ;;  %s72_s19 = int_to_ptr.vmem [resolvable:$true] %s71_s19  ;;  %s97_s24 = int_to_ptr.vmem [resolvable:$true] %s96_s24 }
  0x69   :  { %s3431_s27 = scalar_lea.hbm %s4165_s4, 2048 }
  0x6a   :  { %p3432_p6 = scmp.ne.s32.totalorder %s4165_s4, %s3431_s27  ;;  %p3435_p7 = scmp.lt.u32.totalorder %s3431_s27, %s4165_s4 }
  0x6c   :  { %p3437_p8 = pnand %p3435_p7, %p3432_p6 }
  0x6e   :  { %3440 = shalt.err (!%p3437_p8)
}
  0x6f   :  { %s3441_s2 = scalar_lea.vmem %s72_s19, 2048  ;;  %p3446_p10 = scmp.lt.s32.totalorder %s72_s19, %s72_s19 }
  0x70   :  { %p3442_p9 = scmp.ne.s32.totalorder %s72_s19, %s3441_s2  ;;  %p3447_p11 = scmp.lt.s32.totalorder %s3441_s2, %s3441_s2 }
  0x72   :  { %p3448_p12 = por %p3447_p11, %p3446_p10 }
  0x74   :  { %p3449_p13 = pnand %p3448_p12, %p3442_p9 }
  0x76   :  { %3452 = shalt.err (!%p3449_p13)
}
  0x77   :  { %77 = dma.hbm_to_vmem [thread:$0]  %s4165_s4, 2048, %s72_s19, [#allocation10], %s3533_s21, %s3533_s21, %s3534_s22  }
  0x78   :  { %s3453_s11 = scalar_lea.hbm %s4167_s6, 16 }
  0x79   :  { %p3454_p0 = scmp.ne.s32.totalorder %s4167_s6, %s3453_s11  ;;  %p3457_p1 = scmp.lt.u32.totalorder %s3453_s11, %s4167_s6 }
  0x7b   :  { %p3459_p2 = pnand %p3457_p1, %p3454_p0 }
  0x7d   :  { %3462 = shalt.err (!%p3459_p2)
}
  0x7e   :  { %s3463_s15 = scalar_lea.vmem %s97_s24, 16  ;;  %s3467_s5 = scalar_lea.vmem %s97_s24, 32 }
  0x7f   :  { %p3464_p3 = scmp.ne.s32.totalorder %s97_s24, %s3463_s15  ;;  %p3468_p4 = scmp.lt.s32.totalorder %s97_s24, %s97_s24 }
  0x80   :  { %p3469_p5 = scmp.lt.s32.totalorder %s3467_s5, %s3463_s15 }
  0x82   :  { %p3470_p6 = por %p3469_p5, %p3468_p4 }
  0x84   :  { %p3471_p7 = pnand %p3470_p6, %p3464_p3 }
  0x86   :  { %3474 = shalt.err (!%p3471_p7)
}
  0x87   :  { %99 = dma.hbm_to_vmem [thread:$0]  %s4167_s6, 16, %s97_s24, [#allocation13]  }
  0x88   :  { %s3541_s22 = smov [#allocation17]   ;;  %s3475_s19 = scalar_lea.hbm %s4169_s8, 16 }
  0x89   :  { %s118_s0 = sshll.u32 %s3541_s22, 4  ;;  %p3476_p8 = scmp.ne.s32.totalorder %s4169_s8, %s3475_s19  ;;  %s119_s0 = int_to_ptr.vmem [resolvable:$true] %s118_s0 }
  0x8a   :  { %p3479_p9 = scmp.lt.u32.totalorder %s3475_s19, %s4169_s8 }
  0x8c   :  { %p3481_p10 = pnand %p3479_p9, %p3476_p8 }
  0x8e   :  { %3484 = shalt.err (!%p3481_p10)
}
  0x8f   :  { %s3485_s3 = scalar_lea.vmem %s119_s0, 16  ;;  %s3489_s6 = scalar_lea.vmem %s119_s0, 32 }
  0x90   :  { %p3486_p11 = scmp.ne.s32.totalorder %s119_s0, %s3485_s3  ;;  %p3490_p12 = scmp.lt.s32.totalorder %s119_s0, %s119_s0 }
  0x91   :  { %p3491_p13 = scmp.lt.s32.totalorder %s3489_s6, %s3485_s3 }
  0x93   :  { %p3492_p0 = por %p3491_p13, %p3490_p12 }
  0x95   :  { %p3493_p1 = pnand %p3492_p0, %p3486_p11 }
  0x97   :  { %3496 = shalt.err (!%p3493_p1)
}
  0x98   :  { %121 = dma.hbm_to_vmem [thread:$0]  %s4169_s8, 16, %s119_s0, [#allocation16]  }
  0x99   :  { %3519 = dma.done.wait [#allocation4], 1024  }
  0x9a   :  { %3520 = vsyncadd [#allocation4], 4294966272 }
  0x9b   :  { %3521 = dma.done.wait [#allocation7], 4096  }
  0x9c   :  { %3522 = vsyncadd [#allocation7], 4294963200 }
  0x9d   :  { %3523 = dma.done.wait [#allocation10], 2064  }
  0x9e   :  { %3524 = vsyncadd [#allocation10], 4294965232 }
  0x9f   :  { %3525 = dma.done.wait [#allocation13], 2064  }
  0xa0   :  { %3526 = vsyncadd [#allocation13], 4294965232 }
  0xa1   :  { %3527 = dma.done.wait [#allocation16], 2064  }
  0xa2   :  { %3528 = vsyncadd [#allocation16], 4294965232  ;;  %v3542_v0 = vmov 0.0|0.0   ;;  %vm3543_vm0 = vmmov 0   ;;  %v3544_v1 = vmov 0.0   ;;  %v149_v2 = vld [vmem:[#allocation6] sm:$0xff] }
  0xa3   :  { %2812 = vmatprep.subr.bf16.mxu1 %v3542_v0  ;;  %2173 = vmatprep.mubr.msk.f32.mxu1 %vm3543_vm0, %v3544_v1  ;;  %v150_v3 = vld [vmem:[#allocation6 + $0x8] sm:$0xff]  ;;  %v293_v4 = vld [vmem:[#allocation8] sm:$0xff]  ;;  %v151_v7 = vld [vmem:[#allocation6 + $0x10] sm:$0xff]  ;;  %s3545_s8 = smov [#allocation18]  }
  0xa4   :  { %v2780_v5 = vpack.c.bf16 %v150_v3, %v149_v2  ;;  %v294_v6 = vld [vmem:[#allocation8 + $0x8] sm:$0xff]  ;;  %v152_v8 = vld [vmem:[#allocation6 + $0x18] sm:$0xff]  ;;  %v295_v11 = vld [vmem:[#allocation8 + $0x10] sm:$0xff]  ;;  %s1744_s28 = sshll.u32 %s3545_s8, 4  ;;  %s1745_s28 = int_to_ptr.vmem [resolvable:$true] %s1744_s28 }
  0xa5   :  { %v3747_v9 = vpack.c.bf16 %v294_v6, %v293_v4  ;;  %v2784_v10 = vpack.c.bf16 %v152_v8, %v151_v7  ;;  %v296_v12 = vld [vmem:[#allocation8 + $0x18] sm:$0xff]  ;;  %v153_v13 = vld [vmem:[#allocation6 + $0x20] sm:$0xff]  ;;  %v154_v14 = vld [vmem:[#allocation6 + $0x28] sm:$0xff]  ;;  %s3497_s7 = scalar_lea.vmem %s1745_s28, 128  ;;  %p3502_p3 = scmp.lt.s32.totalorder %s1745_s28, %s1745_s28 }
  0xa6   :  { %2781 = vmatprep.subr.bf16.mxu0 %v2780_v5  ;;  %v3750_v15 = vpack.c.bf16 %v296_v12, %v295_v11  ;;  %v2788_v16 = vpack.c.bf16 %v154_v14, %v153_v13  ;;  %v297_v17 = vld [vmem:[#allocation8 + $0x20] sm:$0xff]  ;;  %v298_v18 = vld [vmem:[#allocation8 + $0x28] sm:$0xff]  ;;  %v155_v19 = vld [vmem:[#allocation6 + $0x30] sm:$0xff]  ;;  %p3498_p2 = scmp.ne.s32.totalorder %s1745_s28, %s3497_s7  ;;  %p3503_p4 = scmp.lt.s32.totalorder %s3497_s7, %s3497_s7 }
  0xa7   :  { %2783 = vmatpush3.bf16.msra.mxu0 %v2780_v5  ;;  %2814 = vmatpush3.bf16.msra.mxu1 %v3747_v9  ;;  %v156_v20 = vld [vmem:[#allocation6 + $0x38] sm:$0xff]  ;;  %v3754_v21 = vpack.c.bf16 %v298_v18, %v297_v17  ;;  %v299_v23 = vld [vmem:[#allocation8 + $0x30] sm:$0xff]  ;;  %v157_v25 = vld [vmem:[#allocation6 + $0x40] sm:$0xff] }
  0xa8   :  { %2785 = vmatprep.subr.bf16.mxu0 %v2784_v10  ;;  %2815 = vmatprep.subr.bf16.mxu1 %v3542_v0  ;;  %v2792_v22 = vpack.c.bf16 %v156_v20, %v155_v19  ;;  %v300_v24 = vld [vmem:[#allocation8 + $0x38] sm:$0xff]  ;;  %v158_v26 = vld [vmem:[#allocation6 + $0x48] sm:$0xff]  ;;  %v166_v27 = vld [vmem:[#allocation3] sm:$0xff]  ;;  %p3504_p5 = por %p3503_p4, %p3502_p3 }
  0xa9   :  { %2129 = vmatprep.mubr.f32.mxu0 %v166_v27  ;;  %v3758_v28 = vpack.c.bf16 %v300_v24, %v299_v23  ;;  %v2796_v29 = vpack.c.bf16 %v158_v26, %v157_v25  ;;  %v301_v30 = vld [vmem:[#allocation8 + $0x40] sm:$0xff]  ;;  %v302_v31 = vld [vmem:[#allocation8 + $0x48] sm:$0xff]  ;;  %v159_v32 = vld [vmem:[#allocation6 + $0x50] sm:$0xff] }
  0xaa   :  { %v160_v33 = vld [vmem:[#allocation6 + $0x58] sm:$0xff]  ;;  %v3762_v34 = vpack.c.bf16 %v302_v31, %v301_v30  ;;  %v303_v36 = vld [vmem:[#allocation8 + $0x50] sm:$0xff]  ;;  %v161_v38 = vld [vmem:[#allocation6 + $0x60] sm:$0xff]  ;;  %p3505_p6 = pnand %p3504_p5, %p3498_p2 }
  0xab   :  { %2787 = vmatpush3.bf16.msra.mxu0 %v2784_v10  ;;  %2817 = vmatpush3.bf16.msra.mxu1 %v3750_v15  ;;  %v2800_v35 = vpack.c.bf16 %v160_v33, %v159_v32  ;;  %v304_v37 = vld [vmem:[#allocation8 + $0x58] sm:$0xff]  ;;  %v162_v39 = vld [vmem:[#allocation6 + $0x68] sm:$0xff]  ;;  %v305_v42 = vld [vmem:[#allocation8 + $0x60] sm:$0xff] }
  0xac   :  { %2789 = vmatprep.subr.bf16.mxu0 %v2788_v16  ;;  %2818 = vmatprep.subr.bf16.mxu1 %v3542_v0  ;;  %v3766_v40 = vpack.c.bf16 %v304_v37, %v303_v36  ;;  %v2804_v41 = vpack.c.bf16 %v162_v39, %v161_v38  ;;  %v306_v43 = vld [vmem:[#allocation8 + $0x68] sm:$0xff]  ;;  %v163_v44 = vld [vmem:[#allocation6 + $0x70] sm:$0xff]  ;;  %v164_v45 = vld [vmem:[#allocation6 + $0x78] sm:$0xff] }
  0xad   :  { %v3770_v46 = vpack.c.bf16 %v306_v43, %v305_v42  ;;  %v2808_v47 = vpack.c.bf16 %v164_v45, %v163_v44  ;;  %v307_v48 = vld [vmem:[#allocation8 + $0x70] sm:$0xff]  ;;  %v308_v49 = vld [vmem:[#allocation8 + $0x78] sm:$0xff]  ;;  %v167_v51 = vld [vmem:[#allocation3 + $0x8] sm:$0xff] }
  0xae   :  { %v3774_v50 = vpack.c.bf16 %v308_v49, %v307_v48  ;;  %v168_v52 = vld [vmem:[#allocation3 + $0x10] sm:$0xff]  ;;  %v169_v53 = vld [vmem:[#allocation3 + $0x18] sm:$0xff]  ;;  %v170_v54 = vld [vmem:[#allocation3 + $0x20] sm:$0xff] }
  0xaf   :  { %2791 = vmatpush3.bf16.msra.mxu0 %v2788_v16  ;;  %2820 = vmatpush3.bf16.msra.mxu1 %v3754_v21  ;;  %v171_v55 = vld [vmem:[#allocation3 + $0x28] sm:$0xff]  ;;  %v172_v56 = vld [vmem:[#allocation3 + $0x30] sm:$0xff]  ;;  %v173_v57 = vld [vmem:[#allocation3 + $0x38] sm:$0xff] }
  0xb0   :  { %2793 = vmatprep.subr.bf16.mxu0 %v2792_v22  ;;  %2821 = vmatprep.subr.bf16.mxu1 %v3542_v0  ;;  %v3817_v58 = vld [vmem:[#allocation9] ss:$0 sm:$0xff]  ;;  %v902_v37 = vld [vmem:[#allocation11 + $0x10] sm:$0xff]  ;;  %v905_v42 = vld [vmem:[#allocation11 + $0x28] sm:$0xff] }
  0xb1   :  { %v903_v38 = vld [vmem:[#allocation11 + $0x18] sm:$0xff]  ;;  %v906_v44 = vld [vmem:[#allocation11 + $0x30] sm:$0xff]  ;;  %v909_v48 = vld [vmem:[#allocation11 + $0x48] sm:$0xff] }
  0xb2   :  { %v3008_v39 = vpack.c.bf16 %v903_v38, %v902_v37  ;;  %v907_v45 = vld [vmem:[#allocation11 + $0x38] sm:$0xff] }
  0xb3   :  { %2795 = vmatpush3.bf16.msra.mxu0 %v2792_v22  ;;  %2823 = vmatpush3.bf16.msra.mxu1 %v3758_v28 }
  0xb4   :  { %2797 = vmatprep.subr.bf16.mxu0 %v2796_v29  ;;  %2824 = vmatprep.subr.bf16.mxu1 %v3542_v0 }
  0xb7   :  { %2799 = vmatpush3.bf16.msra.mxu0 %v2796_v29  ;;  %2826 = vmatpush3.bf16.msra.mxu1 %v3762_v34 }
  0xb8   :  { %2801 = vmatprep.subr.bf16.mxu0 %v2800_v35  ;;  %2827 = vmatprep.subr.bf16.mxu1 %v3542_v0 }
  0xbb   :  { %2803 = vmatpush3.bf16.msra.mxu0 %v2800_v35  ;;  %2829 = vmatpush3.bf16.msra.mxu1 %v3766_v40 }
  0xbc   :  { %2805 = vmatprep.subr.bf16.mxu0 %v2804_v41  ;;  %2830 = vmatprep.subr.bf16.mxu1 %v3542_v0 }
  0xbf   :  { %2807 = vmatpush3.bf16.msra.mxu0 %v2804_v41  ;;  %2832 = vmatpush3.bf16.msra.mxu1 %v3770_v46  ;;  %v904_v41 = vld [vmem:[#allocation11 + $0x20] sm:$0xff] }
  0xc0   :  { %2809 = vmatprep.subr.bf16.mxu0 %v2808_v47  ;;  %2833 = vmatprep.subr.bf16.mxu1 %v3542_v0  ;;  %v3012_v43 = vpack.c.bf16 %v905_v42, %v904_v41 }
  0xc3   :  { %2811 = vmatpush3.bf16.msra.mxu0 %v2808_v47  ;;  %2835 = vmatpush3.bf16.msra.mxu1 %v3774_v50  ;;  %v908_v47 = vld [vmem:[#allocation11 + $0x40] sm:$0xff] }
  0xc4   :  { %2836 = vmatprep.subr.bf16.mxu0 %v3542_v0  ;;  %2860 = vmatprep.subr.bf16.mxu1 %v3542_v0  ;;  %v3020_v49 = vpack.c.bf16 %v909_v48, %v908_v47 }
  0xc6   :  { %2130 = vmatmul.mubr.f32.vlgmr.msra.gmra.mrb[0].mxu0 %v167_v51  ;;  %2174 = vmatmul.mubr.f32.vlgmr.msra.gmra.mrb[0].mxu1 %v3544_v1  ;;  %v911_v51 = vld [vmem:[#allocation11 + $0x58] sm:$0xff] }
  0xc7   :  { %2838 = vmatpush3.bf16.msra.mxu0 %v3747_v9  ;;  %2862 = vmatpush3.bf16.msra.mxu1 %v3747_v9 }
  0xc8   :  { %2839 = vmatprep.subr.bf16.mxu0 %v3542_v0  ;;  %2863 = vmatprep.subr.bf16.mxu1 %v3542_v0 }
  0xc9   :  { %2243 = vmatprep.mubr.msk.f32.mxu1 %vm3543_vm0, %v3544_v1  ;;  %2132 = vmatprep.mubr.f32.mxu0 %v168_v52 }
  0xca   :  { %2133 = vmatmul.mubr.f32.gmra.mrb[2].mxu0 %v169_v53  ;;  %v912_v53 = vld [vmem:[#allocation11 + $0x60] sm:$0xff] }
  0xcb   :  { %2841 = vmatpush3.bf16.msra.mxu0 %v3750_v15  ;;  %2865 = vmatpush3.bf16.msra.mxu1 %v3750_v15 }
  0xcc   :  { %2842 = vmatprep.subr.bf16.mxu0 %v3542_v0  ;;  %2866 = vmatprep.subr.bf16.mxu1 %v3542_v0 }
  0xcd   :  { %2135 = vmatprep.mubr.f32.mxu0 %v170_v54  ;;  %v913_v54 = vld [vmem:[#allocation11 + $0x68] sm:$0xff] }
  0xce   :  { %2136 = vmatmul.mubr.f32.gmra.mrb[4].mxu0 %v171_v55  ;;  %v3028_v55 = vpack.c.bf16 %v913_v54, %v912_v53 }
  0xcf   :  { %2844 = vmatpush3.bf16.msra.mxu0 %v3754_v21  ;;  %2868 = vmatpush3.bf16.msra.mxu1 %v3754_v21 }
  0xd0   :  { %2845 = vmatprep.subr.bf16.mxu0 %v3542_v0  ;;  %2869 = vmatprep.subr.bf16.mxu1 %v3542_v0 }
  0xd1   :  { %2138 = vmatprep.mubr.f32.mxu0 %v172_v56  ;;  %v914_v56 = vld [vmem:[#allocation11 + $0x70] sm:$0xff] }
  0xd2   :  { %2139 = vmatmul.mubr.f32.gmra.mrb[6].mxu0 %v173_v57  ;;  %v915_v57 = vld [vmem:[#allocation11 + $0x78] sm:$0xff] }
  0xd3   :  { %2847 = vmatpush3.bf16.msra.mxu0 %v3758_v28  ;;  %2871 = vmatpush3.bf16.msra.mxu1 %v3758_v28 }
  0xd4   :  { %2848 = vmatprep.subr.bf16.mxu0 %v3542_v0  ;;  %2872 = vmatprep.subr.bf16.mxu1 %v3542_v0 }
  0xd5   :  { %2208 = vmatprep.mubr.msk.f32.mxu0 %vm3543_vm0, %v3544_v1 }
  0xd7   :  { %2850 = vmatpush3.bf16.msra.mxu0 %v3762_v34  ;;  %2874 = vmatpush3.bf16.msra.mxu1 %v3762_v34 }
  0xd8   :  { %2851 = vmatprep.subr.bf16.mxu0 %v3542_v0  ;;  %2875 = vmatprep.subr.bf16.mxu1 %v3542_v0 }
  0xdb   :  { %2853 = vmatpush3.bf16.msra.mxu0 %v3766_v40  ;;  %2877 = vmatpush3.bf16.msra.mxu1 %v3766_v40 }
  0xdc   :  { %2854 = vmatprep.subr.bf16.mxu0 %v3542_v0  ;;  %2878 = vmatprep.subr.bf16.mxu1 %v3542_v0 }
  0xdf   :  { %2856 = vmatpush3.bf16.msra.mxu0 %v3770_v46  ;;  %2880 = vmatpush3.bf16.msra.mxu1 %v3770_v46 }
  0xe0   :  { %2857 = vmatprep.subr.bf16.mxu0 %v3542_v0  ;;  %2881 = vmatprep.subr.bf16.mxu1 %v3542_v0 }
  0xe3   :  { %2859 = vmatpush3.bf16.msra.mxu0 %v3774_v50  ;;  %2883 = vmatpush3.bf16.msra.mxu1 %v3774_v50 }
  0xe4   :  { %2884 = vmatprep.subr.bf16.mxu0 %v3542_v0  ;;  %2908 = vmatprep.subr.bf16.mxu1 %v3542_v0 }
 0x199   :  { %v2131_v59 = vpop.f32.mrb[0].mxu0  ;;  %v376_v60 = vpop.f32.mrb[0].mxu1 }
 0x19a   :  { %v246_v61 = vpop.f32.mrb[1].mxu0  ;;  %v2175_v62 = vpop.f32.mrb[1].mxu1  ;;  %v252_v11 = vadd.f32 %v2131_v59, %v3817_v58  ;;  %v3032_v59 = vpack.c.bf16 %v915_v57, %v914_v56 }
 0x19b   :  { %v247_v63 = vadd.f32 %v3817_v58, %v246_v61  ;;  %v1045_v61 = vld [vmem:[#allocation12 + $0x8] sm:$0xff] }
 0x19d   :  { %v377_v2 = vadd.f32 %v376_v60, %v247_v63  ;;  %v2134_v4 = vpop.f32.mrb[2].mxu0  ;;  %v1044_v60 = vld [vmem:[#allocation12] sm:$0xff]  ;;  %v1046_v63 = vld [vmem:[#allocation12 + $0x10] sm:$0xff] }
 0x19e   :  { %v256_v5 = vpop.f32.mrb[3].mxu0  ;;  %v262_v23 = vadd.f32 %v2134_v4, %v3817_v58  ;;  %v3945_v62 = vpack.c.bf16 %v1045_v61, %v1044_v60  ;;  %v1048_v4 = vld [vmem:[#allocation12 + $0x20] sm:$0xff] }
 0x19f   :  { %3267 = vtanh.f32 %v377_v2  ;;  %v257_v17 = vadd.f32 %v3817_v58, %v256_v5  ;;  %v1047_v2 = vld [vmem:[#allocation12 + $0x18] sm:$0xff]  ;;  %v1049_v5 = vld [vmem:[#allocation12 + $0x28] sm:$0xff] }
 0x1a1   :  { %v3841_v6 = vpop.f32.mrb[4].mxu0 }
 0x1a2   :  { %v3843_v7 = vpop.f32.mrb[5].mxu0 }
 0x1a3   :  { %v267_v29 = vadd.f32 %v3817_v58, %v3843_v7  ;;  %v1050_v7 = vld [vmem:[#allocation12 + $0x30] sm:$0xff] }
 0x1a5   :  { %v3845_v8 = vpop.f32.mrb[6].mxu0 }
 0x1a6   :  { %v3847_v10 = vpop.f32.mrb[7].mxu0 }
 0x1a9   :  { %v3820_v3 = vpop.eup %3267 }
 0x1aa   :  { %2209 = vmatmul.mubr.f32.vlgmr.msra.gmra.mrb[8].mxu0 %v3820_v3 }
 0x1ab   :  { %2886 = vmatpush3.bf16.msra.mxu0 %v3747_v9  ;;  %2278 = vmatprep.mubr.msk.f32.mxu0 %vm3543_vm0, %v3544_v1 }
 0x1ac   :  { %2887 = vmatprep.subr.bf16.mxu0 %v3542_v0 }
 0x1af   :  { %2889 = vmatpush3.bf16.msra.mxu0 %v3750_v15 }
 0x1b0   :  { %2890 = vmatprep.subr.bf16.mxu0 %v3542_v0 }
 0x1b3   :  { %2892 = vmatpush3.bf16.msra.mxu0 %v3754_v21 }
 0x1b4   :  { %2893 = vmatprep.subr.bf16.mxu0 %v3542_v0 }
 0x1b7   :  { %2895 = vmatpush3.bf16.msra.mxu0 %v3758_v28 }
 0x1b8   :  { %2896 = vmatprep.subr.bf16.mxu0 %v3542_v0 }
 0x1bb   :  { %2898 = vmatpush3.bf16.msra.mxu0 %v3762_v34 }
 0x1bc   :  { %2899 = vmatprep.subr.bf16.mxu0 %v3542_v0 }
 0x1bf   :  { %2901 = vmatpush3.bf16.msra.mxu0 %v3766_v40 }
 0x1c0   :  { %2902 = vmatprep.subr.bf16.mxu0 %v3542_v0 }
 0x1c3   :  { %2904 = vmatpush3.bf16.msra.mxu0 %v3770_v46 }
 0x1c4   :  { %2905 = vmatprep.subr.bf16.mxu0 %v3542_v0 }
 0x1c7   :  { %2907 = vmatpush3.bf16.msra.mxu0 %v3774_v50 }
 0x1c8   :  { %2932 = vmatprep.subr.bf16.mxu0 %v3542_v0 }
 0x27d   :  { %v450_v12 = vpop.f32.mrb[8].mxu0 }
 0x27e   :  { %v451_v13 = vadd.f32 %v450_v12, %v252_v11  ;;  %v2210_v14 = vpop.f32.mrb[9].mxu0  ;;  %v1051_v11 = vld [vmem:[#allocation12 + $0x38] sm:$0xff] }
 0x27f   :  { %v3957_v12 = vpack.c.bf16 %v1051_v11, %v1050_v7  ;;  %v1053_v14 = vld [vmem:[#allocation12 + $0x48] sm:$0xff] }
 0x280   :  { %3269 = vtanh.f32 %v451_v13  ;;  %v1052_v13 = vld [vmem:[#allocation12 + $0x40] sm:$0xff] }
 0x28a   :  { %v3850_v16 = vpop.eup %3269 }
 0x28b   :  { %2244 = vmatmul.mubr.f32.vlgmr.msra.gmra.mrb[2].mxu1 %v3850_v16 }
 0x28c   :  { %2910 = vmatpush3.bf16.msra.mxu1 %v3747_v9  ;;  %2313 = vmatprep.mubr.msk.f32.mxu1 %vm3543_vm0, %v3544_v1 }
 0x28d   :  { %2911 = vmatprep.subr.bf16.mxu1 %v3542_v0 }
 0x290   :  { %2913 = vmatpush3.bf16.msra.mxu1 %v3750_v15 }
 0x291   :  { %2914 = vmatprep.subr.bf16.mxu1 %v3542_v0 }
 0x294   :  { %2916 = vmatpush3.bf16.msra.mxu1 %v3754_v21 }
 0x295   :  { %2917 = vmatprep.subr.bf16.mxu1 %v3542_v0 }
 0x298   :  { %2919 = vmatpush3.bf16.msra.mxu1 %v3758_v28 }
 0x299   :  { %2920 = vmatprep.subr.bf16.mxu1 %v3542_v0 }
 0x29c   :  { %2922 = vmatpush3.bf16.msra.mxu1 %v3762_v34 }
 0x29d   :  { %2923 = vmatprep.subr.bf16.mxu1 %v3542_v0 }
 0x2a0   :  { %2925 = vmatpush3.bf16.msra.mxu1 %v3766_v40 }
 0x2a1   :  { %2926 = vmatprep.subr.bf16.mxu1 %v3542_v0 }
 0x2a4   :  { %2928 = vmatpush3.bf16.msra.mxu1 %v3770_v46 }
 0x2a5   :  { %2929 = vmatprep.subr.bf16.mxu1 %v3542_v0 }
 0x2a8   :  { %2931 = vmatpush3.bf16.msra.mxu1 %v3774_v50 }
 0x2a9   :  { %2956 = vmatprep.subr.bf16.mxu1 %v3542_v0 }
 0x35e   :  { %v524_v18 = vpop.f32.mrb[2].mxu1 }
 0x35f   :  { %v525_v19 = vadd.f32 %v524_v18, %v257_v17  ;;  %v2245_v20 = vpop.f32.mrb[3].mxu1  ;;  %v1054_v17 = vld [vmem:[#allocation12 + $0x50] sm:$0xff]  ;;  %v1055_v18 = vld [vmem:[#allocation12 + $0x58] sm:$0xff] }
 0x360   :  { %v1056_v20 = vld [vmem:[#allocation12 + $0x60] sm:$0xff] }
 0x361   :  { %3271 = vtanh.f32 %v525_v19  ;;  %v3965_v19 = vpack.c.bf16 %v1055_v18, %v1054_v17  ;;  %v1647_v17 = vld [vmem:[#allocation15 + $0x18] sm:$0xff] }
 0x36b   :  { %v3872_v22 = vpop.eup %3271 }
 0x36c   :  { %2279 = vmatmul.mubr.f32.vlgmr.msra.gmra.mrb[10].mxu0 %v3872_v22 }
 0x36d   :  { %2934 = vmatpush3.bf16.msra.mxu0 %v3747_v9  ;;  %2348 = vmatprep.mubr.msk.f32.mxu0 %vm3543_vm0, %v3544_v1 }
 0x36e   :  { %2935 = vmatprep.subr.bf16.mxu0 %v3542_v0 }
 0x371   :  { %2937 = vmatpush3.bf16.msra.mxu0 %v3750_v15 }
 0x372   :  { %2938 = vmatprep.subr.bf16.mxu0 %v3542_v0 }
 0x375   :  { %2940 = vmatpush3.bf16.msra.mxu0 %v3754_v21 }
 0x376   :  { %2941 = vmatprep.subr.bf16.mxu0 %v3542_v0 }
 0x379   :  { %2943 = vmatpush3.bf16.msra.mxu0 %v3758_v28 }
 0x37a   :  { %2944 = vmatprep.subr.bf16.mxu0 %v3542_v0 }
 0x37d   :  { %2946 = vmatpush3.bf16.msra.mxu0 %v3762_v34 }
 0x37e   :  { %2947 = vmatprep.subr.bf16.mxu0 %v3542_v0 }
 0x381   :  { %2949 = vmatpush3.bf16.msra.mxu0 %v3766_v40 }
 0x382   :  { %2950 = vmatprep.subr.bf16.mxu0 %v3542_v0 }
 0x385   :  { %2952 = vmatpush3.bf16.msra.mxu0 %v3770_v46 }
 0x386   :  { %2953 = vmatprep.subr.bf16.mxu0 %v3542_v0 }
 0x389   :  { %2955 = vmatpush3.bf16.msra.mxu0 %v3774_v50 }
 0x38a   :  { %2980 = vmatprep.subr.bf16.mxu0 %v3542_v0 }
 0x43f   :  { %v598_v24 = vpop.f32.mrb[10].mxu0 }
 0x440   :  { %v599_v25 = vadd.f32 %v598_v24, %v262_v23  ;;  %v2280_v26 = vpop.f32.mrb[11].mxu0  ;;  %v1058_v24 = vld [vmem:[#allocation12 + $0x70] sm:$0xff] }
 0x442   :  { %3273 = vtanh.f32 %v599_v25  ;;  %v1059_v25 = vld [vmem:[#allocation12 + $0x78] sm:$0xff] }
 0x443   :  { %v3973_v26 = vpack.c.bf16 %v1059_v25, %v1058_v24  ;;  %v1651_v24 = vld [vmem:[#allocation15 + $0x38] sm:$0xff] }
 0x44c   :  { %v3894_v27 = vpop.eup %3273 }
 0x44d   :  { %2314 = vmatmul.mubr.f32.vlgmr.msra.gmra.mrb[4].mxu1 %v3894_v27 }
 0x44e   :  { %2958 = vmatpush3.bf16.msra.mxu1 %v3747_v9  ;;  %2383 = vmatprep.mubr.msk.f32.mxu1 %vm3543_vm0, %v3544_v1 }
 0x44f   :  { %2959 = vmatprep.subr.bf16.mxu1 %v3542_v0 }
 0x452   :  { %2961 = vmatpush3.bf16.msra.mxu1 %v3750_v15 }
 0x453   :  { %2962 = vmatprep.subr.bf16.mxu1 %v3542_v0 }
 0x456   :  { %2964 = vmatpush3.bf16.msra.mxu1 %v3754_v21 }
 0x457   :  { %2965 = vmatprep.subr.bf16.mxu1 %v3542_v0 }
 0x45a   :  { %2967 = vmatpush3.bf16.msra.mxu1 %v3758_v28 }
 0x45b   :  { %2968 = vmatprep.subr.bf16.mxu1 %v3542_v0 }
 0x45e   :  { %2970 = vmatpush3.bf16.msra.mxu1 %v3762_v34 }
 0x45f   :  { %2971 = vmatprep.subr.bf16.mxu1 %v3542_v0 }
 0x462   :  { %2973 = vmatpush3.bf16.msra.mxu1 %v3766_v40 }
 0x463   :  { %2974 = vmatprep.subr.bf16.mxu1 %v3542_v0 }
 0x466   :  { %2976 = vmatpush3.bf16.msra.mxu1 %v3770_v46 }
 0x467   :  { %2977 = vmatprep.subr.bf16.mxu1 %v3542_v0 }
 0x46a   :  { %2979 = vmatpush3.bf16.msra.mxu1 %v3774_v50 }
 0x520   :  { %v672_v30 = vpop.f32.mrb[4].mxu1 }
 0x521   :  { %v673_v31 = vadd.f32 %v672_v30, %v267_v29  ;;  %v2315_v32 = vpop.f32.mrb[5].mxu1 }
 0x523   :  { %3275 = vtanh.f32 %v673_v31 }
 0x52d   :  { %v3916_v33 = vpop.eup %3275 }
 0x52e   :  { %2349 = vmatmul.mubr.f32.vlgmr.msra.gmra.mrb[12].mxu0 %v3916_v33 }
 0x52f   :  { %2982 = vmatpush3.bf16.msra.mxu0 %v3747_v9  ;;  %2418 = vmatprep.mubr.msk.f32.mxu0 %vm3543_vm0, %v3544_v1  ;;  %v900_v9 = vld [vmem:[#allocation11] sm:$0xff] }
 0x530   :  { %2983 = vmatprep.subr.bf16.mxu0 %v3542_v0 }
 0x533   :  { %2985 = vmatpush3.bf16.msra.mxu0 %v3750_v15  ;;  %v901_v15 = vld [vmem:[#allocation11 + $0x8] sm:$0xff] }
 0x534   :  { %2986 = vmatprep.subr.bf16.mxu0 %v3542_v0 }
 0x537   :  { %2988 = vmatpush3.bf16.msra.mxu0 %v3754_v21  ;;  %v3004_v21 = vpack.c.bf16 %v901_v15, %v900_v9 }
 0x538   :  { %2989 = vmatprep.subr.bf16.mxu0 %v3542_v0 }
 0x539   :  { %3005 = vmatprep.subr.bf16.mxu1 %v3004_v21 }
 0x53b   :  { %2991 = vmatpush3.bf16.msra.mxu0 %v3758_v28  ;;  %v272_v28 = vadd.f32 %v3841_v6, %v3817_v58  ;;  %v3953_v6 = vpack.c.bf16 %v1049_v5, %v1048_v4 }
 0x53c   :  { %2992 = vmatprep.subr.bf16.mxu0 %v3542_v0 }
 0x53f   :  { %2994 = vmatpush3.bf16.msra.mxu0 %v3762_v34 }
 0x540   :  { %2995 = vmatprep.subr.bf16.mxu0 %v3542_v0 }
 0x543   :  { %2997 = vmatpush3.bf16.msra.mxu0 %v3766_v40 }
 0x544   :  { %2998 = vmatprep.subr.bf16.mxu0 %v3542_v0 }
 0x547   :  { %3000 = vmatpush3.bf16.msra.mxu0 %v3770_v46  ;;  %v3016_v46 = vpack.c.bf16 %v907_v45, %v906_v44 }
 0x548   :  { %3001 = vmatprep.subr.bf16.mxu0 %v3542_v0 }
 0x54b   :  { %3003 = vmatpush3.bf16.msra.mxu0 %v3774_v50  ;;  %v910_v50 = vld [vmem:[#allocation11 + $0x50] sm:$0xff] }
 0x54c   :  { %3036 = vmatprep.subr.bf16.mxu0 %v3542_v0  ;;  %v3024_v52 = vpack.c.bf16 %v911_v51, %v910_v50 }
 0x601   :  { %v746_v34 = vpop.f32.mrb[12].mxu0 }
 0x602   :  { %v747_v35 = vadd.f32 %v746_v34, %v272_v28  ;;  %v2350_v36 = vpop.f32.mrb[13].mxu0  ;;  %v282_v34 = vadd.f32 %v3845_v8, %v3817_v58 }
 0x604   :  { %3277 = vtanh.f32 %v747_v35 }
 0x60e   :  { %v3278_v40 = vpop.eup %3277 }
 0x60f   :  { %2384 = vmatmul.mubr.f32.vlgmr.msra.gmra.mrb[6].mxu1 %v3278_v40 }
 0x610   :  { %3007 = vmatpush3.bf16.msra.mxu1 %v3004_v21  ;;  %2453 = vmatprep.mubr.f32.mxu1 %v3820_v3  ;;  %v3949_v3 = vpack.c.bf16 %v1047_v2, %v1046_v63 }
 0x611   :  { %3009 = vmatprep.subr.bf16.mxu1 %v3008_v39 }
 0x614   :  { %3011 = vmatpush3.bf16.msra.mxu1 %v3008_v39  ;;  %v4030_v39 = vld [vmem:[#allocation14] ss:$0 sm:$0xff] }
 0x615   :  { %3013 = vmatprep.subr.bf16.mxu1 %v3012_v43 }
 0x618   :  { %3015 = vmatpush3.bf16.msra.mxu1 %v3012_v43 }
 0x619   :  { %3017 = vmatprep.subr.bf16.mxu1 %v3016_v46 }
 0x61c   :  { %3019 = vmatpush3.bf16.msra.mxu1 %v3016_v46 }
 0x61d   :  { %3021 = vmatprep.subr.bf16.mxu1 %v3020_v49 }
 0x620   :  { %3023 = vmatpush3.bf16.msra.mxu1 %v3020_v49 }
 0x621   :  { %3025 = vmatprep.subr.bf16.mxu1 %v3024_v52 }
 0x624   :  { %3027 = vmatpush3.bf16.msra.mxu1 %v3024_v52 }
 0x625   :  { %3029 = vmatprep.subr.bf16.mxu1 %v3028_v55 }
 0x628   :  { %3031 = vmatpush3.bf16.msra.mxu1 %v3028_v55 }
 0x629   :  { %3033 = vmatprep.subr.bf16.mxu1 %v3032_v59 }
 0x62c   :  { %3035 = vmatpush3.bf16.msra.mxu1 %v3032_v59 }
 0x62d   :  { %3060 = vmatprep.subr.bf16.mxu1 %v3542_v0 }
 0x62f   :  { %2454 = vmatmul.mubr.f32.vlgmr.msra.gmra.mrb[8].mxu1 %v3850_v16  ;;  %v3961_v16 = vpack.c.bf16 %v1053_v14, %v1052_v13  ;;  %v1645_v13 = vld [vmem:[#allocation15 + $0x8] sm:$0xff]  ;;  %v1646_v14 = vld [vmem:[#allocation15 + $0x10] sm:$0xff] }
 0x630   :  { %2456 = vmatprep.mubr.f32.mxu1 %v3872_v22  ;;  %3062 = vmatpush3.bf16.msra.mxu1 %v3945_v62  ;;  %v1057_v22 = vld [vmem:[#allocation12 + $0x68] sm:$0xff]  ;;  %v3232_v18 = vpack.c.bf16 %v1647_v17, %v1646_v14 }
 0x631   :  { %3063 = vmatprep.subr.bf16.mxu1 %v3542_v0  ;;  %v3969_v23 = vpack.c.bf16 %v1057_v22, %v1056_v20  ;;  %v1649_v20 = vld [vmem:[#allocation15 + $0x28] sm:$0xff] }
 0x633   :  { %2457 = vmatmul.mubr.f32.gmra.mrb[10].mxu1 %v3894_v27  ;;  %v277_v27 = vadd.f32 %v3817_v58, %v3847_v10 }
 0x634   :  { %2459 = vmatprep.mubr.f32.mxu1 %v3916_v33  ;;  %3065 = vmatpush3.bf16.msra.mxu1 %v3949_v3 }
 0x635   :  { %3066 = vmatprep.subr.bf16.mxu1 %v3542_v0 }
 0x637   :  { %2460 = vmatmul.mubr.f32.gmra.mrb[12].mxu1 %v3278_v40 }
 0x638   :  { %3068 = vmatpush3.bf16.msra.mxu1 %v3953_v6 }
 0x639   :  { %3069 = vmatprep.subr.bf16.mxu1 %v3542_v0 }
 0x63c   :  { %3071 = vmatpush3.bf16.msra.mxu1 %v3957_v12 }
 0x63d   :  { %3072 = vmatprep.subr.bf16.mxu1 %v3542_v0 }
 0x640   :  { %3074 = vmatpush3.bf16.msra.mxu1 %v3961_v16 }
 0x641   :  { %3075 = vmatprep.subr.bf16.mxu1 %v3542_v0 }
 0x644   :  { %3077 = vmatpush3.bf16.msra.mxu1 %v3965_v19 }
 0x645   :  { %3078 = vmatprep.subr.bf16.mxu1 %v3542_v0 }
 0x648   :  { %3080 = vmatpush3.bf16.msra.mxu1 %v3969_v23 }
 0x649   :  { %3081 = vmatprep.subr.bf16.mxu1 %v3542_v0 }
 0x64c   :  { %3083 = vmatpush3.bf16.msra.mxu1 %v3973_v26 }
 0x64d   :  { %3108 = vmatprep.subr.bf16.mxu1 %v3542_v0 }
 0x6e2   :  { %v820_v29 = vpop.f32.mrb[6].mxu1 }
 0x6e3   :  { %v821_v30 = vadd.f32 %v820_v29, %v277_v27  ;;  %v2385_v31 = vpop.f32.mrb[7].mxu1 }
 0x6e5   :  { %3279 = vtanh.f32 %v821_v30 }
 0x6ef   :  { %v3280_v32 = vpop.eup %3279 }
 0x6f0   :  { %2419 = vmatmul.mubr.f32.vlgmr.msra.gmra.mrb[14].mxu0 %v3280_v32  ;;  %2462 = vmatprep.mubr.f32.mxu1 %v3280_v32 }
 0x6f1   :  { %3038 = vmatpush3.bf16.msra.mxu0 %v3945_v62  ;;  %2497 = vmatprep.mubr.msk.f32.mxu0 %vm3543_vm0, %v3544_v1 }
 0x6f2   :  { %3039 = vmatprep.subr.bf16.mxu0 %v3542_v0 }
 0x6f5   :  { %3041 = vmatpush3.bf16.msra.mxu0 %v3949_v3 }
 0x6f6   :  { %3042 = vmatprep.subr.bf16.mxu0 %v3542_v0 }
 0x6f9   :  { %3044 = vmatpush3.bf16.msra.mxu0 %v3953_v6 }
 0x6fa   :  { %3045 = vmatprep.subr.bf16.mxu0 %v3542_v0 }
 0x6fd   :  { %3047 = vmatpush3.bf16.msra.mxu0 %v3957_v12 }
 0x6fe   :  { %3048 = vmatprep.subr.bf16.mxu0 %v3542_v0 }
 0x701   :  { %3050 = vmatpush3.bf16.msra.mxu0 %v3961_v16 }
 0x702   :  { %v3990_v10 = vpop.f32.mrb[8].mxu1  ;;  %3051 = vmatprep.subr.bf16.mxu0 %v3542_v0 }
 0x703   :  { %v997_v33 = vpop.f32.mrb[9].mxu1  ;;  %v1003_v45 = vadd.f32 %v3990_v10, %v4030_v39 }
 0x704   :  { %v998_v40 = vadd.f32 %v4030_v39, %v997_v33  ;;  %v1654_v33 = vld [vmem:[#allocation15 + $0x50] sm:$0xff] }
 0x705   :  { %3053 = vmatpush3.bf16.msra.mxu0 %v3965_v19 }
 0x706   :  { %v3994_v9 = vpop.f32.mrb[10].mxu1  ;;  %3054 = vmatprep.subr.bf16.mxu0 %v3542_v0 }
 0x707   :  { %v3997_v15 = vpop.f32.mrb[11].mxu1  ;;  %v1013_v55 = vadd.f32 %v3994_v9, %v4030_v39  ;;  %v1655_v9 = vld [vmem:[#allocation15 + $0x58] sm:$0xff] }
 0x708   :  { %v1008_v50 = vadd.f32 %v4030_v39, %v3997_v15  ;;  %v3244_v15 = vpack.c.bf16 %v1655_v9, %v1654_v33 }
 0x709   :  { %3056 = vmatpush3.bf16.msra.mxu0 %v3969_v23 }
 0x70a   :  { %v4000_v21 = vpop.f32.mrb[12].mxu1  ;;  %3057 = vmatprep.subr.bf16.mxu0 %v3542_v0 }
 0x70b   :  { %v4003_v28 = vpop.f32.mrb[13].mxu1 }
 0x70c   :  { %v1018_v61 = vadd.f32 %v4030_v39, %v4003_v28  ;;  %v1657_v28 = vld [vmem:[#allocation15 + $0x68] sm:$0xff] }
 0x70d   :  { %3059 = vmatpush3.bf16.msra.mxu0 %v3973_v26 }
 0x70e   :  { %3084 = vmatprep.subr.bf16.mxu0 %v3542_v0 }
 0x710   :  { %2498 = vmatmul.mubr.f32.vlgmr.msra.gmra.mrb[16].mxu0 %v3544_v1 }
 0x711   :  { %3086 = vmatpush3.bf16.msra.mxu0 %v3945_v62  ;;  %2567 = vmatprep.mubr.msk.f32.mxu0 %vm3543_vm0, %v3544_v1 }
 0x712   :  { %3087 = vmatprep.subr.bf16.mxu0 %v3542_v0 }
 0x715   :  { %3089 = vmatpush3.bf16.msra.mxu0 %v3949_v3 }
 0x716   :  { %3090 = vmatprep.subr.bf16.mxu0 %v3542_v0 }
 0x719   :  { %3092 = vmatpush3.bf16.msra.mxu0 %v3953_v6 }
 0x71a   :  { %3093 = vmatprep.subr.bf16.mxu0 %v3542_v0 }
 0x71d   :  { %3095 = vmatpush3.bf16.msra.mxu0 %v3957_v12 }
 0x71e   :  { %3096 = vmatprep.subr.bf16.mxu0 %v3542_v0 }
 0x721   :  { %3098 = vmatpush3.bf16.msra.mxu0 %v3961_v16 }
 0x722   :  { %3099 = vmatprep.subr.bf16.mxu0 %v3542_v0 }
 0x725   :  { %3101 = vmatpush3.bf16.msra.mxu0 %v3965_v19 }
 0x726   :  { %3102 = vmatprep.subr.bf16.mxu0 %v3542_v0 }
 0x729   :  { %3104 = vmatpush3.bf16.msra.mxu0 %v3969_v23 }
 0x72a   :  { %3105 = vmatprep.subr.bf16.mxu0 %v3542_v0 }
 0x72d   :  { %3107 = vmatpush3.bf16.msra.mxu0 %v3973_v26 }
 0x72e   :  { %3132 = vmatprep.subr.bf16.mxu0 %v3542_v0 }
 0x7c3   :  { %v894_v35 = vpop.f32.mrb[14].mxu0 }
 0x7c4   :  { %v895_v36 = vadd.f32 %v894_v35, %v282_v34  ;;  %v2420_v37 = vpop.f32.mrb[15].mxu0  ;;  %v1658_v35 = vld [vmem:[#allocation15 + $0x70] sm:$0xff] }
 0x7c6   :  { %3281 = vtanh.f32 %v895_v36  ;;  %v1659_v36 = vld [vmem:[#allocation15 + $0x78] sm:$0xff] }
 0x7c7   :  { %v3250_v37 = vpack.c.bf16 %v1659_v36, %v1658_v35 }
 0x7d0   :  { %v3282_v38 = vpop.eup %3281 }
 0x7d1   :  { %2463 = vmatmul.mubr.f32.gmra.mrb[14].mxu1 %v3282_v38 }
 0x7d2   :  { %2532 = vmatprep.mubr.msk.f32.mxu1 %vm3543_vm0, %v3544_v1 }
 0x7e3   :  { %v1127_v41 = vpop.f32.mrb[16].mxu0 }
 0x7e4   :  { %v1128_v42 = vadd.f32 %v1127_v41, %v998_v40  ;;  %v2499_v43 = vpop.f32.mrb[17].mxu0 }
 0x7e6   :  { %3283 = vtanh.f32 %v1128_v42 }
 0x7f0   :  { %v3284_v44 = vpop.eup %3283 }
 0x7f1   :  { %2533 = vmatmul.mubr.f32.vlgmr.msra.gmra.mrb[16].mxu1 %v3284_v44  ;;  %v1759_v44 = vld [vmem:[#allocation17] ss:$0 sm:$0xff] }
 0x7f2   :  { %3110 = vmatpush3.bf16.msra.mxu1 %v3945_v62  ;;  %2602 = vmatprep.mubr.msk.f32.mxu1 %vm3543_vm0, %v3544_v1 }
 0x7f3   :  { %3111 = vmatprep.subr.bf16.mxu1 %v3542_v0 }
 0x7f6   :  { %3113 = vmatpush3.bf16.msra.mxu1 %v3949_v3 }
 0x7f7   :  { %3114 = vmatprep.subr.bf16.mxu1 %v3542_v0 }
 0x7fa   :  { %3116 = vmatpush3.bf16.msra.mxu1 %v3953_v6 }
 0x7fb   :  { %3117 = vmatprep.subr.bf16.mxu1 %v3542_v0 }
 0x7fe   :  { %3119 = vmatpush3.bf16.msra.mxu1 %v3957_v12 }
 0x7ff   :  { %3120 = vmatprep.subr.bf16.mxu1 %v3542_v0 }
 0x802   :  { %3122 = vmatpush3.bf16.msra.mxu1 %v3961_v16 }
 0x803   :  { %3123 = vmatprep.subr.bf16.mxu1 %v3542_v0 }
 0x806   :  { %3125 = vmatpush3.bf16.msra.mxu1 %v3965_v19 }
 0x807   :  { %3126 = vmatprep.subr.bf16.mxu1 %v3542_v0 }
 0x80a   :  { %3128 = vmatpush3.bf16.msra.mxu1 %v3969_v23 }
 0x80b   :  { %3129 = vmatprep.subr.bf16.mxu1 %v3542_v0 }
 0x80e   :  { %3131 = vmatpush3.bf16.msra.mxu1 %v3973_v26 }
 0x80f   :  { %3156 = vmatprep.subr.bf16.mxu1 %v3542_v0 }
 0x8a4   :  { %v4051_v58 = vpop.f32.mrb[14].mxu1 }
 0x8a5   :  { %v4053_v8 = vpop.f32.mrb[15].mxu1  ;;  %v1033_v38 = vadd.f32 %v4051_v58, %v4030_v39 }
 0x8a6   :  { %v1028_v29 = vadd.f32 %v4030_v39, %v4053_v8 }
 0x8c4   :  { %v1200_v46 = vpop.f32.mrb[16].mxu1 }
 0x8c5   :  { %v1201_v47 = vadd.f32 %v1200_v46, %v1003_v45  ;;  %v2534_v48 = vpop.f32.mrb[17].mxu1 }
 0x8c7   :  { %3285 = vtanh.f32 %v1201_v47 }
 0x8d1   :  { %v3286_v49 = vpop.eup %3285 }
 0x8d2   :  { %2568 = vmatmul.mubr.f32.vlgmr.msra.gmra.mrb[18].mxu0 %v3286_v49 }
 0x8d3   :  { %3134 = vmatpush3.bf16.msra.mxu0 %v3945_v62  ;;  %2637 = vmatprep.mubr.msk.f32.mxu0 %vm3543_vm0, %v3544_v1 }
 0x8d4   :  { %3135 = vmatprep.subr.bf16.mxu0 %v3542_v0 }
 0x8d7   :  { %3137 = vmatpush3.bf16.msra.mxu0 %v3949_v3 }
 0x8d8   :  { %3138 = vmatprep.subr.bf16.mxu0 %v3542_v0 }
 0x8db   :  { %3140 = vmatpush3.bf16.msra.mxu0 %v3953_v6 }
 0x8dc   :  { %3141 = vmatprep.subr.bf16.mxu0 %v3542_v0 }
 0x8df   :  { %3143 = vmatpush3.bf16.msra.mxu0 %v3957_v12 }
 0x8e0   :  { %3144 = vmatprep.subr.bf16.mxu0 %v3542_v0 }
 0x8e3   :  { %3146 = vmatpush3.bf16.msra.mxu0 %v3961_v16 }
 0x8e4   :  { %3147 = vmatprep.subr.bf16.mxu0 %v3542_v0 }
 0x8e7   :  { %3149 = vmatpush3.bf16.msra.mxu0 %v3965_v19 }
 0x8e8   :  { %3150 = vmatprep.subr.bf16.mxu0 %v3542_v0 }
 0x8eb   :  { %3152 = vmatpush3.bf16.msra.mxu0 %v3969_v23 }
 0x8ec   :  { %3153 = vmatprep.subr.bf16.mxu0 %v3542_v0 }
 0x8ef   :  { %3155 = vmatpush3.bf16.msra.mxu0 %v3973_v26 }
 0x8f0   :  { %3180 = vmatprep.subr.bf16.mxu0 %v3542_v0 }
 0x9a5   :  { %v1273_v51 = vpop.f32.mrb[18].mxu0 }
 0x9a6   :  { %v1274_v52 = vadd.f32 %v1273_v51, %v1008_v50  ;;  %v2569_v53 = vpop.f32.mrb[19].mxu0 }
 0x9a8   :  { %3287 = vtanh.f32 %v1274_v52 }
 0x9b2   :  { %v3288_v54 = vpop.eup %3287 }
 0x9b3   :  { %2603 = vmatmul.mubr.f32.vlgmr.msra.gmra.mrb[18].mxu1 %v3288_v54 }
 0x9b4   :  { %3158 = vmatpush3.bf16.msra.mxu1 %v3945_v62  ;;  %2672 = vmatprep.mubr.msk.f32.mxu1 %vm3543_vm0, %v3544_v1 }
 0x9b5   :  { %3159 = vmatprep.subr.bf16.mxu1 %v3542_v0 }
 0x9b8   :  { %3161 = vmatpush3.bf16.msra.mxu1 %v3949_v3 }
 0x9b9   :  { %3162 = vmatprep.subr.bf16.mxu1 %v3542_v0 }
 0x9bc   :  { %3164 = vmatpush3.bf16.msra.mxu1 %v3953_v6 }
 0x9bd   :  { %3165 = vmatprep.subr.bf16.mxu1 %v3542_v0 }
 0x9c0   :  { %3167 = vmatpush3.bf16.msra.mxu1 %v3957_v12 }
 0x9c1   :  { %3168 = vmatprep.subr.bf16.mxu1 %v3542_v0 }
 0x9c4   :  { %3170 = vmatpush3.bf16.msra.mxu1 %v3961_v16 }
 0x9c5   :  { %3171 = vmatprep.subr.bf16.mxu1 %v3542_v0 }
 0x9c8   :  { %3173 = vmatpush3.bf16.msra.mxu1 %v3965_v19 }
 0x9c9   :  { %3174 = vmatprep.subr.bf16.mxu1 %v3542_v0 }
 0x9cc   :  { %3176 = vmatpush3.bf16.msra.mxu1 %v3969_v23 }
 0x9cd   :  { %3177 = vmatprep.subr.bf16.mxu1 %v3542_v0 }
 0x9d0   :  { %3179 = vmatpush3.bf16.msra.mxu1 %v3973_v26 }
 0x9d1   :  { %3204 = vmatprep.subr.bf16.mxu1 %v3542_v0 }
 0xa86   :  { %v1346_v56 = vpop.f32.mrb[18].mxu1 }
 0xa87   :  { %v1347_v57 = vadd.f32 %v1346_v56, %v1013_v55  ;;  %v2604_v59 = vpop.f32.mrb[19].mxu1 }
 0xa89   :  { %3289 = vtanh.f32 %v1347_v57 }
 0xa93   :  { %v3290_v60 = vpop.eup %3289 }
 0xa94   :  { %2638 = vmatmul.mubr.f32.vlgmr.msra.gmra.mrb[20].mxu0 %v3290_v60 }
 0xa95   :  { %3182 = vmatpush3.bf16.msra.mxu0 %v3945_v62  ;;  %2707 = vmatprep.mubr.msk.f32.mxu0 %vm3543_vm0, %v3544_v1 }
 0xa96   :  { %3183 = vmatprep.subr.bf16.mxu0 %v3542_v0 }
 0xa99   :  { %3185 = vmatpush3.bf16.msra.mxu0 %v3949_v3 }
 0xa9a   :  { %3186 = vmatprep.subr.bf16.mxu0 %v3542_v0 }
 0xa9d   :  { %3188 = vmatpush3.bf16.msra.mxu0 %v3953_v6 }
 0xa9e   :  { %3189 = vmatprep.subr.bf16.mxu0 %v3542_v0 }
 0xaa1   :  { %3191 = vmatpush3.bf16.msra.mxu0 %v3957_v12 }
 0xaa2   :  { %3192 = vmatprep.subr.bf16.mxu0 %v3542_v0 }
 0xaa5   :  { %3194 = vmatpush3.bf16.msra.mxu0 %v3961_v16 }
 0xaa6   :  { %3195 = vmatprep.subr.bf16.mxu0 %v3542_v0 }
 0xaa9   :  { %3197 = vmatpush3.bf16.msra.mxu0 %v3965_v19 }
 0xaaa   :  { %3198 = vmatprep.subr.bf16.mxu0 %v3542_v0 }
 0xaad   :  { %3200 = vmatpush3.bf16.msra.mxu0 %v3969_v23 }
 0xaae   :  { %3201 = vmatprep.subr.bf16.mxu0 %v3542_v0 }
 0xab1   :  { %3203 = vmatpush3.bf16.msra.mxu0 %v3973_v26 }
 0xab2   :  { %3228 = vmatprep.subr.bf16.mxu0 %v3542_v0 }
 0xb67   :  { %v1419_v63 = vpop.f32.mrb[20].mxu0 }
 0xb68   :  { %v1420_v2 = vadd.f32 %v1419_v63, %v1018_v61  ;;  %v2639_v4 = vpop.f32.mrb[21].mxu0 }
 0xb6a   :  { %3291 = vtanh.f32 %v1420_v2 }
 0xb74   :  { %v3292_v5 = vpop.eup %3291 }
 0xb75   :  { %2673 = vmatmul.mubr.f32.vlgmr.msra.gmra.mrb[20].mxu1 %v3292_v5 }
 0xb76   :  { %3206 = vmatpush3.bf16.msra.mxu1 %v3945_v62  ;;  %2742 = vmatprep.mubr.msk.f32.mxu1 %vm3543_vm0, %v3544_v1  ;;  %v1023_v62 = vadd.f32 %v4000_v21, %v4030_v39  ;;  %v1656_v21 = vld [vmem:[#allocation15 + $0x60] sm:$0xff] }
 0xb77   :  { %3207 = vmatprep.subr.bf16.mxu1 %v3542_v0  ;;  %v3247_v34 = vpack.c.bf16 %v1657_v28, %v1656_v21 }
 0xb7a   :  { %3209 = vmatpush3.bf16.msra.mxu1 %v3949_v3 }
 0xb7b   :  { %3210 = vmatprep.subr.bf16.mxu1 %v3542_v0 }
 0xb7e   :  { %3212 = vmatpush3.bf16.msra.mxu1 %v3953_v6 }
 0xb7f   :  { %3213 = vmatprep.subr.bf16.mxu1 %v3542_v0 }
 0xb82   :  { %3215 = vmatpush3.bf16.msra.mxu1 %v3957_v12  ;;  %v1644_v12 = vld [vmem:[#allocation15] sm:$0xff] }
 0xb83   :  { %3216 = vmatprep.subr.bf16.mxu1 %v3542_v0 }
 0xb86   :  { %3218 = vmatpush3.bf16.msra.mxu1 %v3961_v16  ;;  %v3229_v16 = vpack.c.bf16 %v1645_v13, %v1644_v12 }
 0xb87   :  { %3219 = vmatprep.subr.bf16.mxu1 %v3542_v0 }
 0xb8a   :  { %3221 = vmatpush3.bf16.msra.mxu1 %v3965_v19  ;;  %v1648_v19 = vld [vmem:[#allocation15 + $0x20] sm:$0xff] }
 0xb8b   :  { %3222 = vmatprep.subr.bf16.mxu1 %v3542_v0  ;;  %v3235_v22 = vpack.c.bf16 %v1649_v20, %v1648_v19 }
 0xb8e   :  { %3224 = vmatpush3.bf16.msra.mxu1 %v3969_v23  ;;  %v1650_v23 = vld [vmem:[#allocation15 + $0x30] sm:$0xff] }
 0xb8f   :  { %3225 = vmatprep.subr.bf16.mxu1 %v3542_v0  ;;  %v3238_v25 = vpack.c.bf16 %v1651_v24, %v1650_v23 }
 0xb92   :  { %3227 = vmatpush3.bf16.msra.mxu1 %v3973_v26  ;;  %v1653_v26 = vld [vmem:[#allocation15 + $0x48] sm:$0xff] }
 0xc48   :  { %v1492_v3 = vpop.f32.mrb[20].mxu1 }
 0xc49   :  { %v1493_v6 = vadd.f32 %v1492_v3, %v1023_v62  ;;  %v2674_v7 = vpop.f32.mrb[21].mxu1 }
 0xc4b   :  { %3293 = vtanh.f32 %v1493_v6 }
 0xc55   :  { %v3294_v11 = vpop.eup %3293 }
 0xc56   :  { %2708 = vmatmul.mubr.f32.vlgmr.msra.gmra.mrb[22].mxu0 %v3294_v11 }
 0xc57   :  { %2777 = vmatprep.mubr.msk.f32.mxu0 %vm3543_vm0, %v3544_v1  ;;  %3230 = vmatpush3.bf16.msra.mxu0 %v3229_v16  ;;  %v1652_v1 = vld [vmem:[#allocation15 + $0x40] sm:$0xff] }
 0xc58   :  { %3231 = vmatprep.subr.bf16.mxu0 %v3542_v0  ;;  %v3241_v27 = vpack.c.bf16 %v1653_v26, %v1652_v1 }
 0xc5b   :  { %3233 = vmatpush3.bf16.msra.mxu0 %v3232_v18 }
 0xc5c   :  { %3234 = vmatprep.subr.bf16.mxu0 %v3542_v0 }
 0xc5f   :  { %3236 = vmatpush3.bf16.msra.mxu0 %v3235_v22 }
 0xc60   :  { %3237 = vmatprep.subr.bf16.mxu0 %v3542_v0 }
 0xc63   :  { %3239 = vmatpush3.bf16.msra.mxu0 %v3238_v25 }
 0xc64   :  { %3240 = vmatprep.subr.bf16.mxu0 %v3542_v0 }
 0xc67   :  { %3242 = vmatpush3.bf16.msra.mxu0 %v3241_v27 }
 0xc68   :  { %3243 = vmatprep.subr.bf16.mxu0 %v3542_v0 }
 0xc6b   :  { %3245 = vmatpush3.bf16.msra.mxu0 %v3244_v15 }
 0xc6c   :  { %3246 = vmatprep.subr.bf16.mxu0 %v3542_v0 }
 0xc6f   :  { %3248 = vmatpush3.bf16.msra.mxu0 %v3247_v34 }
 0xc70   :  { %3249 = vmatprep.subr.bf16.mxu0 %v3542_v0 }
 0xc73   :  { %3251 = vmatpush3.bf16.msra.mxu0 %v3250_v37 }
 0xd29   :  { %v1565_v30 = vpop.f32.mrb[22].mxu0 }
 0xd2a   :  { %v1566_v31 = vadd.f32 %v1565_v30, %v1028_v29  ;;  %v2709_v32 = vpop.f32.mrb[23].mxu0 }
 0xd2c   :  { %3295 = vtanh.f32 %v1566_v31 }
 0xd36   :  { %v3296_v10 = vpop.eup %3295 }
 0xd37   :  { %2743 = vmatmul.mubr.f32.vlgmr.msra.gmra.mrb[22].mxu1 %v3296_v10 }
 0xe0a   :  { %v1638_v40 = vpop.f32.mrb[22].mxu1 }
 0xe0b   :  { %v1639_v41 = vadd.f32 %v1638_v40, %v1033_v38  ;;  %v2744_v42 = vpop.f32.mrb[23].mxu1 }
 0xe0d   :  { %3297 = vtanh.f32 %v1639_v41 }
 0xe17   :  { %v3298_v43 = vpop.eup %3297 }
 0xe18   :  { %2778 = vmatmul.mubr.f32.vlgmr.msra.gmra.mrb[24].mxu0 %v3298_v43 }
 0xeeb   :  { %v1733_v8 = vpop.f32.mrb[24].mxu0 }
 0xeec   :  { %v1734_v45 = vadd.f32 %v1759_v44, %v1733_v8  ;;  %v2779_v46 = vpop.f32.mrb[25].mxu0 }
 0xeee   :  { %1737 = vst [vmem:[#allocation18] sm:$0xff] %v1734_v45 }
 0xeef   :  { %3508 = shalt.err (!%p3505_p6)
}
 0xef0   :  { %s3509_s18 = scalar_lea.hbm %s4170_s9, 128 }
 0xef1   :  { %p3510_p7 = scmp.ne.s32.totalorder %s4170_s9, %s3509_s18  ;;  %p3513_p8 = scmp.lt.u32.totalorder %s3509_s18, %s4170_s9 }
 0xef3   :  { %p3515_p9 = pnand %p3513_p8, %p3510_p7 }
 0xef5   :  { %3518 = shalt.err (!%p3515_p9)
}
 0xef6   :  { %1747 = dma.vmem_to_hbm [thread:$0]  %s1745_s28, 128, %s4170_s9, [#allocation5]  }
 0xef7   :  { %3529 = dma.done.wait [#allocation5], 128  }
 0xef8   :  { %3530 = vsyncadd [#allocation5], 4294967168 }
 0xef9   :  { %1751 = vsyncpa [#allocation4], 1 }
 0xefa   :  { %1752 = vsyncpa [#allocation7], 1 }
 0xefb   :  { %1753 = vsyncpa [#allocation10], 1 }
 0xefc   :  { %1754 = vsyncpa [#allocation13], 1 }
 0xefd   :  { %1755 = vsyncpa [#allocation16], 1 }
 0xefe   :  { %1756 = vsyncpa [#allocation5], 1 }

</bundles_post_ra>
